<compile_context>
chip_gen: v6e
topology: v6e:2x2x1
jax: 0.10.0
libtpu: 0.0.40
codegen_flags: <defaults>
</compile_context>

<pallas_src>
import math

import jax
import jax.numpy as jnp
from jax import lax
from jax.experimental import pallas as pl
from jax.experimental.pallas import tpu as pltpu


def _make_mha_kernel(n_head: int, d_model: int, compute_dtype):
    dh = d_model // n_head
    inv_h = 1.0 / n_head

    def kernel(xkv_ref, wq_ref, bq_ref, wkv_ref, bkv_ref, wfc_ref, bfc_ref,
               out_ref, attn_ref, kv_ref, ctx_ref):
        qi = pl.program_id(1)
        tq = out_ref.shape[1]
        L = xkv_ref.shape[1]

        # --- K/V projection hoisted out of the query-tile axis: computed only
        # on the first query tile of each batch element, reused afterwards.
        @pl.when(qi == 0)
        def _():
            x_full = xkv_ref[0]                                    # (L, D)
            kv_ref[...] = (jnp.dot(x_full, wkv_ref[...],
                                   preferred_element_type=jnp.float32)
                           + bkv_ref[...]).astype(kv_ref.dtype)    # (L, 2D)

        # --- Query rows come straight from the resident x slab (no separate
        # Q input / DMA stream).
        row0 = pl.multiple_of(qi * tq, tq)
        xq = xkv_ref[0, pl.ds(row0, tq), :]                        # (tq, D)

        # Q projection (softmax scale already folded into wq / bq by wrapper).
        q = (jnp.dot(xq, wq_ref[...], preferred_element_type=jnp.float32)
             + bq_ref[...]).astype(compute_dtype)                  # (tq, D)

        attn_sum = jnp.zeros((tq, L), jnp.float32)

        for h in range(n_head):                 # static unroll over heads
            lo = h * dh
            qh = q[:, lo:lo + dh]                                  # (tq, dh)
            kh = kv_ref[:, lo:lo + dh]                             # (L, dh)
            vh = kv_ref[:, d_model + lo:d_model + lo + dh]         # (L, dh)

            # scores: contract last dims -> no explicit transpose of K.
            s = lax.dot_general(
                qh, kh,
                dimension_numbers=(((1,), (1,)), ((), ())),
                preferred_element_type=jnp.float32)                # (tq, L)

            # numerically-stable softmax (f32); exact normalization -- the
            # reciprocal acts on a (tq, 1) column so it is essentially free,
            # and attention rows sum exactly to 1 in the returned attn_avg.
            s = s - jnp.max(s, axis=-1, keepdims=True)
            p = jnp.exp(s)
            p = p * pl.reciprocal(jnp.sum(p, axis=-1, keepdims=True),
                                  approx=False)

            attn_sum = attn_sum + p

            # Per-head context goes into the (tq, D) ctx scratch at its lane
            # offset; single bf16 cast of p feeds the ctx matmul.
            ctx_ref[:, lo:lo + dh] = jnp.dot(
                p.astype(compute_dtype), vh,
                preferred_element_type=jnp.float32).astype(ctx_ref.dtype)

        # One full-depth (tq, D) x (D, D) FC matmul after the head loop.
        out_ref[0] = (jnp.dot(ctx_ref[...], wfc_ref[...],
                              preferred_element_type=jnp.float32)
                      + bfc_ref[...]).astype(out_ref.dtype)
        attn_ref[0] = (attn_sum * inv_h).astype(attn_ref.dtype)

    return kernel


def _pick_block_q(L: int, block_q: int) -> int:
    """Largest divisor of L <= block_q, preferring multiples of 8."""
    if L <= block_q:
        return L
    for d in range(block_q, 7, -1):
        if L % d == 0 and d % 8 == 0:
            return d
    for d in range(block_q, 0, -1):
        if L % d == 0:
            return d
    return L


def multi_head_attn(x, w_qkv, b_qkv, w_fc, b_fc, *, n_head=8, scale=True,
                    compute_dtype=jnp.bfloat16, block_q=256):
    """x: (B, L, D).  Returns (out (B, L, D), attn_avg (B, L, L) f32)."""
    B, L, D = x.shape
    assert D % n_head == 0
    dh = D // n_head
    scale_val = math.sqrt(dh) if scale else 1.0
    inv_scale = 1.0 / scale_val
    out_dtype = x.dtype

    # Query-row tiling: keeps the per-step working set ~tq*L instead of L*L.
    tq = _pick_block_q(L, block_q)
    nq = L // tq

    # --- Wrapper-side weight prep (no transposes / scaling inside the kernel).
    # torch Linear stores W as (out_features, in_features); we pass W^T so the
    # MXU consumes the natural layout.  Fold 1/scale into the Q projection.
    w_q_t = (w_qkv[:D, :].T * inv_scale).astype(compute_dtype)        # (D, D)
    b_q = (b_qkv[:D] * inv_scale).reshape(1, D).astype(jnp.float32)
    w_kv_t = w_qkv[D:, :].T.astype(compute_dtype)                     # (D, 2D)
    b_kv = b_qkv[D:].reshape(1, 2 * D).astype(jnp.float32)
    w_fc_t = w_fc.T.astype(compute_dtype)                             # (D, D)
    b_fc2 = b_fc.reshape(1, D).astype(jnp.float32)

    x_c = x.astype(compute_dtype)

    cd = jnp.dtype(compute_dtype).itemsize
    od = jnp.dtype(out_dtype).itemsize

    # VMEM footprint: x block (2-buf), weights (1-buf), outputs (2-buf),
    # KV / ctx scratch, f32 temporaries (kv projection, p, attn_sum, q).
    est = (2 * L * D * cd
           + 4 * D * D * cd + 4 * D * 4
           + 2 * (tq * D * od + tq * L * 4)
           + (2 * L * D + tq * D) * cd
           + 2 * L * D * 4
           + 3 * tq * L * 4 + 2 * tq * D * 4)

    try:
        vmem_cap = int(getattr(pltpu.get_tpu_info(), "vmem_capacity_bytes",
                               128 * 2 ** 20))
    except Exception:  # pragma: no cover - conservative fallback off-TPU
        vmem_cap = 128 * 2 ** 20
    # Leave ~25% headroom for Mosaic internal scratch / pipeline buffers.
    vmem_limit = int(min(int(0.75 * vmem_cap),
                         max(32 * 2 ** 20, int(1.5 * est))))

    kernel = _make_mha_kernel(n_head, D, compute_dtype)

    # Constant operands (index_map is constant) -> single-buffered.
    def const_spec(shape):
        return pl.BlockSpec(shape, lambda b, qi: (0, 0),
                            pipeline_mode=pl.Buffered(1))

    flops = int(2 * B * L * D * 3 * D        # qkv projections
                + 4 * B * L * L * D          # scores + ctx (all heads)
                + 2 * B * L * D * D)         # output FC
    transcendentals = int(B * n_head * L * L)
    bytes_accessed = int(B * L * D * cd + 4 * D * D * cd + 4 * D * 4
                         + B * L * D * od + B * L * L * 4)

    out, attn_avg = pl.pallas_call(
        kernel,
        out_shape=(
            jax.ShapeDtypeStruct((B, L, D), out_dtype),
            jax.ShapeDtypeStruct((B, L, L), jnp.float32),
        ),
        grid_spec=pltpu.PrefetchScalarGridSpec(
            num_scalar_prefetch=0,
            grid=(B, nq),
            in_specs=[
                pl.BlockSpec((1, L, D), lambda b, qi: (b, 0, 0)),  # x rows
                const_spec((D, D)),                                # W_q^T/scale
                const_spec((1, D)),                                # b_q/scale
                const_spec((D, 2 * D)),                            # W_kv^T
                const_spec((1, 2 * D)),                            # b_kv
                const_spec((D, D)),                                # W_fc^T
                const_spec((1, D)),                                # b_fc
            ],
            out_specs=[
                pl.BlockSpec((1, tq, D), lambda b, qi: (b, qi, 0)),
                pl.BlockSpec((1, tq, L), lambda b, qi: (b, qi, 0)),
            ],
            scratch_shapes=[
                pltpu.VMEM((L, 2 * D), compute_dtype),   # K/V slab (per batch)
                pltpu.VMEM((tq, D), compute_dtype),      # head-concat context
            ],
        ),
        compiler_params=pltpu.CompilerParams(
            # qi must be "arbitrary": the KV scratch computed at qi == 0 is
            # reused sequentially across query tiles; B stays "parallel".
            dimension_semantics=("parallel", "arbitrary"),
            vmem_limit_bytes=vmem_limit),
        cost_estimate=pl.CostEstimate(flops=flops,
                                      transcendentals=transcendentals,
                                      bytes_accessed=bytes_accessed),
    )(x_c, w_q_t, b_q, w_kv_t, b_kv, w_fc_t, b_fc2)
    return out, attn_avg


def _reference(x, w_qkv, b_qkv, w_fc, b_fc, n_head, scale_val):
    """Pure-JAX f32 reference mirroring the PyTorch forward (eval mode)."""
    B, L, D = x.shape
    dh = D // n_head
    qkv = x @ w_qkv.T + b_qkv                                   # (B, L, 3D)
    q, k, v = jnp.split(qkv, 3, axis=-1)
    q = q.reshape(B, L, n_head, dh).transpose(0, 2, 1, 3)       # (B, H, L, dh)
    k = k.reshape(B, L, n_head, dh).transpose(0, 2, 3, 1)       # (B, H, dh, L)
    v = v.reshape(B, L, n_head, dh).transpose(0, 2, 1, 3)       # (B, H, L, dh)
    attn = jnp.matmul(q, k) / scale_val                         # (B, H, L, L)
    attn = jax.nn.softmax(attn, axis=-1)
    ctx = jnp.matmul(attn, v)                                   # (B, H, L, dh)
    ctx = ctx.transpose(0, 2, 1, 3).reshape(B, L, D)
    out = ctx @ w_fc.T + b_fc
    return out, attn.sum(axis=1) / n_head


if __name__ == "__main__":
    B, L, D, H = 2, 8, 32, 8
    key = jax.random.PRNGKey(0)
    kx, kw1, kb1, kw2, kb2 = jax.random.split(key, 5)

    x = jax.random.normal(kx, (B, L, D), dtype=jnp.float32)

    # Parameter init (shapes per nn.Linear(d_model, 3*d_model) and
    # nn.Linear(d_model, d_model)); uniform(-1/sqrt(D), 1/sqrt(D)) like torch.
    bound = 1.0 / math.sqrt(D)
    w_qkv = jax.random.uniform(kw1, (3 * D, D), jnp.float32, -bound, bound)
    b_qkv = jax.random.uniform(kb1, (3 * D,), jnp.float32, -bound, bound)
    w_fc = jax.random.uniform(kw2, (D, D), jnp.float32, -bound, bound)
    b_fc = jax.random.uniform(kb2, (D,), jnp.float32, -bound, bound)

    out, attn_avg = multi_head_attn(x, w_qkv, b_qkv, w_fc, b_fc,
                                    n_head=H, scale=True)
    jax.block_until_ready((out, attn_avg))

    ref_out, ref_attn = _reference(x, w_qkv, b_qkv, w_fc, b_fc,
                                   n_head=H, scale_val=math.sqrt(D // H))
    assert out.shape == (B, L, D) and attn_avg.shape == (B, L, L)
    # bf16 matmul operands -> loosened tolerances (softmax / accumulation f32).
    assert jnp.allclose(out.astype(jnp.float32), ref_out, atol=5e-2, rtol=5e-2)
    assert jnp.allclose(attn_avg, ref_attn, atol=2e-2, rtol=2e-2)

    print("KERNEL_OK")
</pallas_src>

<mosaic_0001>
module attributes {stable_mosaic.version = 11 : i64} {
  func.func @kernel(%arg0: i32, %arg1: i32, %arg2: memref<1x8x32xbf16, #tpu.memory_space<vmem>>, %arg3: memref<32x32xbf16, #tpu.memory_space<vmem>>, %arg4: memref<1x32xf32, #tpu.memory_space<vmem>>, %arg5: memref<32x64xbf16, #tpu.memory_space<vmem>>, %arg6: memref<1x64xf32, #tpu.memory_space<vmem>>, %arg7: memref<32x32xbf16, #tpu.memory_space<vmem>>, %arg8: memref<1x32xf32, #tpu.memory_space<vmem>>, %arg9: memref<1x8x32xf32, #tpu.memory_space<vmem>>, %arg10: memref<1x8x8xf32, #tpu.memory_space<vmem>>, %arg11: memref<8x64xbf16, #tpu.memory_space<vmem>>, %arg12: memref<8x32xbf16, #tpu.memory_space<vmem>>) attributes {dimension_semantics = [#tpu.dimension_semantics<parallel>, #tpu.dimension_semantics<arbitrary>], iteration_bounds = array<i64: 2, 1>, scalar_prefetch = 0 : i64, scratch_operands = 2 : i64, tpu.core_type = #tpu.core_type<tc>, window_params = [{transform_indices = @transform_0, window_bounds = array<i64: 1, 8, 32>}, {pipeline_mode = #tpu.pipeline_mode<synchronous>, transform_indices = @transform_1, window_bounds = array<i64: 32, 32>}, {pipeline_mode = #tpu.pipeline_mode<synchronous>, transform_indices = @transform_2, window_bounds = array<i64: 1, 32>}, {pipeline_mode = #tpu.pipeline_mode<synchronous>, transform_indices = @transform_3, window_bounds = array<i64: 32, 64>}, {pipeline_mode = #tpu.pipeline_mode<synchronous>, transform_indices = @transform_4, window_bounds = array<i64: 1, 64>}, {pipeline_mode = #tpu.pipeline_mode<synchronous>, transform_indices = @transform_5, window_bounds = array<i64: 32, 32>}, {pipeline_mode = #tpu.pipeline_mode<synchronous>, transform_indices = @transform_6, window_bounds = array<i64: 1, 32>}, {transform_indices = @transform_7, window_bounds = array<i64: 1, 8, 32>}, {transform_indices = @transform_8, window_bounds = array<i64: 1, 8, 8>}]} {
    %c0_i32 = arith.constant 0 : i32
    %0 = arith.cmpi eq, %arg1, %c0_i32 : i32
    %1 = arith.extui %0 : i1 to i32
    %c0_i32_0 = arith.constant 0 : i32
    %2 = arith.cmpi ne, %1, %c0_i32_0 : i32
    scf.if %2 {
      %c0_86 = arith.constant 0 : index
      %c0_87 = arith.constant 0 : index
      %c0_88 = arith.constant 0 : index
      %181 = vector.load %arg2[%c0_86, %c0_87, %c0_88] : memref<1x8x32xbf16, #tpu.memory_space<vmem>>, vector<1x8x32xbf16>
      %182 = vector.shape_cast %181 : vector<1x8x32xbf16> to vector<8x32xbf16>
      %c0_89 = arith.constant 0 : index
      %c0_90 = arith.constant 0 : index
      %183 = vector.load %arg5[%c0_89, %c0_90] : memref<32x64xbf16, #tpu.memory_space<vmem>>, vector<32x64xbf16>
      %cst_91 = arith.constant dense<0.000000e+00> : vector<8x64xf32>
      %184 = tpu.matmul %182, %183, %cst_91 {dimension_numbers = #tpu.dot_dimension_numbers<[1], [0], [0], [1], [0, 0, 1, 1], [], []>} : vector<8x32xbf16>, vector<32x64xbf16>, vector<8x64xf32> -> vector<8x64xf32>
      %c0_92 = arith.constant 0 : index
      %c0_93 = arith.constant 0 : index
      %185 = vector.load %arg6[%c0_92, %c0_93] : memref<1x64xf32, #tpu.memory_space<vmem>>, vector<1x64xf32>
      %186 = vector.broadcast %185 : vector<1x64xf32> to vector<8x64xf32>
      %187 = arith.addf %184, %186 : vector<8x64xf32>
      %188 = arith.truncf %187 : vector<8x64xf32> to vector<8x64xbf16>
      %c0_94 = arith.constant 0 : index
      %c0_95 = arith.constant 0 : index
      %189 = vector.load %arg11[%c0_94, %c0_95] : memref<8x64xbf16, #tpu.memory_space<vmem>>, vector<8x64xbf16>
      tpu.vector_store %arg11[%c0_94, %c0_95], %188 {strides = array<i32>} : memref<8x64xbf16, #tpu.memory_space<vmem>>, vector<8x64xbf16>,
    } else {
    }
    %c8_i32 = arith.constant 8 : i32
    %3 = arith.muli %arg1, %c8_i32 : i32
    %4 = tpu.assume_multiple %3, 8 : i32
    %c0 = arith.constant 0 : index
    %5 = arith.index_cast %4 : i32 to index
    %c0_1 = arith.constant 0 : index
    %6 = vector.load %arg2[%c0, %5, %c0_1] : memref<1x8x32xbf16, #tpu.memory_space<vmem>>, vector<1x8x32xbf16>
    %7 = vector.shape_cast %6 : vector<1x8x32xbf16> to vector<8x32xbf16>
    %c0_2 = arith.constant 0 : index
    %c0_3 = arith.constant 0 : index
    %8 = vector.load %arg3[%c0_2, %c0_3] : memref<32x32xbf16, #tpu.memory_space<vmem>>, vector<32x32xbf16>
    %cst = arith.constant dense<0.000000e+00> : vector<8x32xf32>
    %9 = tpu.matmul %7, %8, %cst {dimension_numbers = #tpu.dot_dimension_numbers<[1], [0], [0], [1], [0, 0, 1, 1], [], []>} : vector<8x32xbf16>, vector<32x32xbf16>, vector<8x32xf32> -> vector<8x32xf32>
    %c0_4 = arith.constant 0 : index
    %c0_5 = arith.constant 0 : index
    %10 = vector.load %arg4[%c0_4, %c0_5] : memref<1x32xf32, #tpu.memory_space<vmem>>, vector<1x32xf32>
    %11 = vector.broadcast %10 : vector<1x32xf32> to vector<8x32xf32>
    %12 = arith.addf %9, %11 : vector<8x32xf32>
    %13 = arith.truncf %12 : vector<8x32xf32> to vector<8x32xbf16>
    %cst_6 = arith.constant 0.000000e+00 : f32
    %14 = vector.broadcast %cst_6 : f32 to vector<8x8xf32>
    %15 = vector.extract_strided_slice %13 {offsets = [0, 0], sizes = [8, 4], strides = [1, 1]} : vector<8x32xbf16> to vector<8x4xbf16>
    %c0_7 = arith.constant 0 : index
    %c0_8 = arith.constant 0 : index
    %16 = vector.load %arg11[%c0_7, %c0_8] : memref<8x64xbf16, #tpu.memory_space<vmem>>, vector<8x4xbf16>
    %c0_9 = arith.constant 0 : index
    %c32 = arith.constant 32 : index
    %17 = vector.load %arg11[%c0_9, %c32] : memref<8x64xbf16, #tpu.memory_space<vmem>>, vector<8x4xbf16>
    %cst_10 = arith.constant dense<0.000000e+00> : vector<8x8xf32>
    %18 = tpu.matmul %15, %16, %cst_10 {dimension_numbers = #tpu.dot_dimension_numbers<[1], [1], [0], [0], [0, 0, 1, 0], [], []>} : vector<8x4xbf16>, vector<8x4xbf16>, vector<8x8xf32> -> vector<8x8xf32>
    %cst_11 = arith.constant dense<0xFF800000> : vector<8xf32>
    %19 = vector.multi_reduction <maximumf>, %18, %cst_11 [1] : vector<8x8xf32> to vector<8xf32>
    %20 = vector.shape_cast %19 : vector<8xf32> to vector<8x1xf32>
    %21 = vector.broadcast %20 : vector<8x1xf32> to vector<8x8xf32>
    %22 = arith.subf %18, %21 : vector<8x8xf32>
    %23 = math.exp %22 : vector<8x8xf32>
    %cst_12 = arith.constant dense<0.000000e+00> : vector<8xf32>
    %24 = vector.multi_reduction <add>, %23, %cst_12 [1] : vector<8x8xf32> to vector<8xf32>
    %25 = vector.shape_cast %24 : vector<8xf32> to vector<8x1xf32>
    %26 = tpu.reciprocal %25 : vector<8x1xf32> -> vector<8x1xf32>
    %27 = vector.broadcast %26 : vector<8x1xf32> to vector<8x8xf32>
    %28 = arith.mulf %23, %27 : vector<8x8xf32>
    %29 = arith.addf %14, %28 : vector<8x8xf32>
    %30 = arith.truncf %28 : vector<8x8xf32> to vector<8x8xbf16>
    %cst_13 = arith.constant dense<0.000000e+00> : vector<8x4xf32>
    %31 = tpu.matmul %30, %17, %cst_13 {dimension_numbers = #tpu.dot_dimension_numbers<[1], [0], [0], [1], [0, 0, 1, 1], [], []>} : vector<8x8xbf16>, vector<8x4xbf16>, vector<8x4xf32> -> vector<8x4xf32>
    %32 = arith.truncf %31 : vector<8x4xf32> to vector<8x4xbf16>
    %c0_14 = arith.constant 0 : index
    %c0_15 = arith.constant 0 : index
    %33 = vector.load %arg12[%c0_14, %c0_15] : memref<8x32xbf16, #tpu.memory_space<vmem>>, vector<8x4xbf16>
    tpu.vector_store %arg12[%c0_14, %c0_15], %32 {strides = array<i32>} : memref<8x32xbf16, #tpu.memory_space<vmem>>, vector<8x4xbf16>,
    %34 = vector.extract_strided_slice %13 {offsets = [0, 4], sizes = [8, 4], strides = [1, 1]} : vector<8x32xbf16> to vector<8x4xbf16>
    %c0_16 = arith.constant 0 : index
    %c4 = arith.constant 4 : index
    %35 = vector.load %arg11[%c0_16, %c4] : memref<8x64xbf16, #tpu.memory_space<vmem>>, vector<8x4xbf16>
    %c0_17 = arith.constant 0 : index
    %c36 = arith.constant 36 : index
    %36 = vector.load %arg11[%c0_17, %c36] : memref<8x64xbf16, #tpu.memory_space<vmem>>, vector<8x4xbf16>
    %cst_18 = arith.constant dense<0.000000e+00> : vector<8x8xf32>
    %37 = tpu.matmul %34, %35, %cst_18 {dimension_numbers = #tpu.dot_dimension_numbers<[1], [1], [0], [0], [0, 0, 1, 0], [], []>} : vector<8x4xbf16>, vector<8x4xbf16>, vector<8x8xf32> -> vector<8x8xf32>
    %cst_19 = arith.constant dense<0xFF800000> : vector<8xf32>
    %38 = vector.multi_reduction <maximumf>, %37, %cst_19 [1] : vector<8x8xf32> to vector<8xf32>
    %39 = vector.shape_cast %38 : vector<8xf32> to vector<8x1xf32>
    %40 = vector.broadcast %39 : vector<8x1xf32> to vector<8x8xf32>
    %41 = arith.subf %37, %40 : vector<8x8xf32>
    %42 = math.exp %41 : vector<8x8xf32>
    %cst_20 = arith.constant dense<0.000000e+00> : vector<8xf32>
    %43 = vector.multi_reduction <add>, %42, %cst_20 [1] : vector<8x8xf32> to vector<8xf32>
    %44 = vector.shape_cast %43 : vector<8xf32> to vector<8x1xf32>
    %45 = tpu.reciprocal %44 : vector<8x1xf32> -> vector<8x1xf32>
    %46 = vector.broadcast %45 : vector<8x1xf32> to vector<8x8xf32>
    %47 = arith.mulf %42, %46 : vector<8x8xf32>
    %48 = arith.addf %29, %47 : vector<8x8xf32>
    %49 = arith.truncf %47 : vector<8x8xf32> to vector<8x8xbf16>
    %cst_21 = arith.constant dense<0.000000e+00> : vector<8x4xf32>
    %50 = tpu.matmul %49, %36, %cst_21 {dimension_numbers = #tpu.dot_dimension_numbers<[1], [0], [0], [1], [0, 0, 1, 1], [], []>} : vector<8x8xbf16>, vector<8x4xbf16>, vector<8x4xf32> -> vector<8x4xf32>
    %51 = arith.truncf %50 : vector<8x4xf32> to vector<8x4xbf16>
    %c0_22 = arith.constant 0 : index
    %c4_23 = arith.constant 4 : index
    %52 = vector.load %arg12[%c0_22, %c4_23] : memref<8x32xbf16, #tpu.memory_space<vmem>>, vector<8x4xbf16>
    tpu.vector_store %arg12[%c0_22, %c4_23], %51 {strides = array<i32>} : memref<8x32xbf16, #tpu.memory_space<vmem>>, vector<8x4xbf16>,
    %53 = vector.extract_strided_slice %13 {offsets = [0, 8], sizes = [8, 4], strides = [1, 1]} : vector<8x32xbf16> to vector<8x4xbf16>
    %c0_24 = arith.constant 0 : index
    %c8 = arith.constant 8 : index
    %54 = vector.load %arg11[%c0_24, %c8] : memref<8x64xbf16, #tpu.memory_space<vmem>>, vector<8x4xbf16>
    %c0_25 = arith.constant 0 : index
    %c40 = arith.constant 40 : index
    %55 = vector.load %arg11[%c0_25, %c40] : memref<8x64xbf16, #tpu.memory_space<vmem>>, vector<8x4xbf16>
    %cst_26 = arith.constant dense<0.000000e+00> : vector<8x8xf32>
    %56 = tpu.matmul %53, %54, %cst_26 {dimension_numbers = #tpu.dot_dimension_numbers<[1], [1], [0], [0], [0, 0, 1, 0], [], []>} : vector<8x4xbf16>, vector<8x4xbf16>, vector<8x8xf32> -> vector<8x8xf32>
    %cst_27 = arith.constant dense<0xFF800000> : vector<8xf32>
    %57 = vector.multi_reduction <maximumf>, %56, %cst_27 [1] : vector<8x8xf32> to vector<8xf32>
    %58 = vector.shape_cast %57 : vector<8xf32> to vector<8x1xf32>
    %59 = vector.broadcast %58 : vector<8x1xf32> to vector<8x8xf32>
    %60 = arith.subf %56, %59 : vector<8x8xf32>
    %61 = math.exp %60 : vector<8x8xf32>
    %cst_28 = arith.constant dense<0.000000e+00> : vector<8xf32>
    %62 = vector.multi_reduction <add>, %61, %cst_28 [1] : vector<8x8xf32> to vector<8xf32>
    %63 = vector.shape_cast %62 : vector<8xf32> to vector<8x1xf32>
    %64 = tpu.reciprocal %63 : vector<8x1xf32> -> vector<8x1xf32>
    %65 = vector.broadcast %64 : vector<8x1xf32> to vector<8x8xf32>
    %66 = arith.mulf %61, %65 : vector<8x8xf32>
    %67 = arith.addf %48, %66 : vector<8x8xf32>
    %68 = arith.truncf %66 : vector<8x8xf32> to vector<8x8xbf16>
    %cst_29 = arith.constant dense<0.000000e+00> : vector<8x4xf32>
    %69 = tpu.matmul %68, %55, %cst_29 {dimension_numbers = #tpu.dot_dimension_numbers<[1], [0], [0], [1], [0, 0, 1, 1], [], []>} : vector<8x8xbf16>, vector<8x4xbf16>, vector<8x4xf32> -> vector<8x4xf32>
    %70 = arith.truncf %69 : vector<8x4xf32> to vector<8x4xbf16>
    %c0_30 = arith.constant 0 : index
    %c8_31 = arith.constant 8 : index
    %71 = vector.load %arg12[%c0_30, %c8_31] : memref<8x32xbf16, #tpu.memory_space<vmem>>, vector<8x4xbf16>
    tpu.vector_store %arg12[%c0_30, %c8_31], %70 {strides = array<i32>} : memref<8x32xbf16, #tpu.memory_space<vmem>>, vector<8x4xbf16>,
    %72 = vector.extract_strided_slice %13 {offsets = [0, 12], sizes = [8, 4], strides = [1, 1]} : vector<8x32xbf16> to vector<8x4xbf16>
    %c0_32 = arith.constant 0 : index
    %c12 = arith.constant 12 : index
    %73 = vector.load %arg11[%c0_32, %c12] : memref<8x64xbf16, #tpu.memory_space<vmem>>, vector<8x4xbf16>
    %c0_33 = arith.constant 0 : index
    %c44 = arith.constant 44 : index
    %74 = vector.load %arg11[%c0_33, %c44] : memref<8x64xbf16, #tpu.memory_space<vmem>>, vector<8x4xbf16>
    %cst_34 = arith.constant dense<0.000000e+00> : vector<8x8xf32>
    %75 = tpu.matmul %72, %73, %cst_34 {dimension_numbers = #tpu.dot_dimension_numbers<[1], [1], [0], [0], [0, 0, 1, 0], [], []>} : vector<8x4xbf16>, vector<8x4xbf16>, vector<8x8xf32> -> vector<8x8xf32>
    %cst_35 = arith.constant dense<0xFF800000> : vector<8xf32>
    %76 = vector.multi_reduction <maximumf>, %75, %cst_35 [1] : vector<8x8xf32> to vector<8xf32>
    %77 = vector.shape_cast %76 : vector<8xf32> to vector<8x1xf32>
    %78 = vector.broadcast %77 : vector<8x1xf32> to vector<8x8xf32>
    %79 = arith.subf %75, %78 : vector<8x8xf32>
    %80 = math.exp %79 : vector<8x8xf32>
    %cst_36 = arith.constant dense<0.000000e+00> : vector<8xf32>
    %81 = vector.multi_reduction <add>, %80, %cst_36 [1] : vector<8x8xf32> to vector<8xf32>
    %82 = vector.shape_cast %81 : vector<8xf32> to vector<8x1xf32>
    %83 = tpu.reciprocal %82 : vector<8x1xf32> -> vector<8x1xf32>
    %84 = vector.broadcast %83 : vector<8x1xf32> to vector<8x8xf32>
    %85 = arith.mulf %80, %84 : vector<8x8xf32>
    %86 = arith.addf %67, %85 : vector<8x8xf32>
    %87 = arith.truncf %85 : vector<8x8xf32> to vector<8x8xbf16>
    %cst_37 = arith.constant dense<0.000000e+00> : vector<8x4xf32>
    %88 = tpu.matmul %87, %74, %cst_37 {dimension_numbers = #tpu.dot_dimension_numbers<[1], [0], [0], [1], [0, 0, 1, 1], [], []>} : vector<8x8xbf16>, vector<8x4xbf16>, vector<8x4xf32> -> vector<8x4xf32>
    %89 = arith.truncf %88 : vector<8x4xf32> to vector<8x4xbf16>
    %c0_38 = arith.constant 0 : index
    %c12_39 = arith.constant 12 : index
    %90 = vector.load %arg12[%c0_38, %c12_39] : memref<8x32xbf16, #tpu.memory_space<vmem>>, vector<8x4xbf16>
    tpu.vector_store %arg12[%c0_38, %c12_39], %89 {strides = array<i32>} : memref<8x32xbf16, #tpu.memory_space<vmem>>, vector<8x4xbf16>,
    %91 = vector.extract_strided_slice %13 {offsets = [0, 16], sizes = [8, 4], strides = [1, 1]} : vector<8x32xbf16> to vector<8x4xbf16>
    %c0_40 = arith.constant 0 : index
    %c16 = arith.constant 16 : index
    %92 = vector.load %arg11[%c0_40, %c16] : memref<8x64xbf16, #tpu.memory_space<vmem>>, vector<8x4xbf16>
    %c0_41 = arith.constant 0 : index
    %c48 = arith.constant 48 : index
    %93 = vector.load %arg11[%c0_41, %c48] : memref<8x64xbf16, #tpu.memory_space<vmem>>, vector<8x4xbf16>
    %cst_42 = arith.constant dense<0.000000e+00> : vector<8x8xf32>
    %94 = tpu.matmul %91, %92, %cst_42 {dimension_numbers = #tpu.dot_dimension_numbers<[1], [1], [0], [0], [0, 0, 1, 0], [], []>} : vector<8x4xbf16>, vector<8x4xbf16>, vector<8x8xf32> -> vector<8x8xf32>
    %cst_43 = arith.constant dense<0xFF800000> : vector<8xf32>
    %95 = vector.multi_reduction <maximumf>, %94, %cst_43 [1] : vector<8x8xf32> to vector<8xf32>
    %96 = vector.shape_cast %95 : vector<8xf32> to vector<8x1xf32>
    %97 = vector.broadcast %96 : vector<8x1xf32> to vector<8x8xf32>
    %98 = arith.subf %94, %97 : vector<8x8xf32>
    %99 = math.exp %98 : vector<8x8xf32>
    %cst_44 = arith.constant dense<0.000000e+00> : vector<8xf32>
    %100 = vector.multi_reduction <add>, %99, %cst_44 [1] : vector<8x8xf32> to vector<8xf32>
    %101 = vector.shape_cast %100 : vector<8xf32> to vector<8x1xf32>
    %102 = tpu.reciprocal %101 : vector<8x1xf32> -> vector<8x1xf32>
    %103 = vector.broadcast %102 : vector<8x1xf32> to vector<8x8xf32>
    %104 = arith.mulf %99, %103 : vector<8x8xf32>
    %105 = arith.addf %86, %104 : vector<8x8xf32>
    %106 = arith.truncf %104 : vector<8x8xf32> to vector<8x8xbf16>
    %cst_45 = arith.constant dense<0.000000e+00> : vector<8x4xf32>
    %107 = tpu.matmul %106, %93, %cst_45 {dimension_numbers = #tpu.dot_dimension_numbers<[1], [0], [0], [1], [0, 0, 1, 1], [], []>} : vector<8x8xbf16>, vector<8x4xbf16>, vector<8x4xf32> -> vector<8x4xf32>
    %108 = arith.truncf %107 : vector<8x4xf32> to vector<8x4xbf16>
    %c0_46 = arith.constant 0 : index
    %c16_47 = arith.constant 16 : index
    %109 = vector.load %arg12[%c0_46, %c16_47] : memref<8x32xbf16, #tpu.memory_space<vmem>>, vector<8x4xbf16>
    tpu.vector_store %arg12[%c0_46, %c16_47], %108 {strides = array<i32>} : memref<8x32xbf16, #tpu.memory_space<vmem>>, vector<8x4xbf16>,
    %110 = vector.extract_strided_slice %13 {offsets = [0, 20], sizes = [8, 4], strides = [1, 1]} : vector<8x32xbf16> to vector<8x4xbf16>
    %c0_48 = arith.constant 0 : index
    %c20 = arith.constant 20 : index
    %111 = vector.load %arg11[%c0_48, %c20] : memref<8x64xbf16, #tpu.memory_space<vmem>>, vector<8x4xbf16>
    %c0_49 = arith.constant 0 : index
    %c52 = arith.constant 52 : index
    %112 = vector.load %arg11[%c0_49, %c52] : memref<8x64xbf16, #tpu.memory_space<vmem>>, vector<8x4xbf16>
    %cst_50 = arith.constant dense<0.000000e+00> : vector<8x8xf32>
    %113 = tpu.matmul %110, %111, %cst_50 {dimension_numbers = #tpu.dot_dimension_numbers<[1], [1], [0], [0], [0, 0, 1, 0], [], []>} : vector<8x4xbf16>, vector<8x4xbf16>, vector<8x8xf32> -> vector<8x8xf32>
    %cst_51 = arith.constant dense<0xFF800000> : vector<8xf32>
    %114 = vector.multi_reduction <maximumf>, %113, %cst_51 [1] : vector<8x8xf32> to vector<8xf32>
    %115 = vector.shape_cast %114 : vector<8xf32> to vector<8x1xf32>
    %116 = vector.broadcast %115 : vector<8x1xf32> to vector<8x8xf32>
    %117 = arith.subf %113, %116 : vector<8x8xf32>
    %118 = math.exp %117 : vector<8x8xf32>
    %cst_52 = arith.constant dense<0.000000e+00> : vector<8xf32>
    %119 = vector.multi_reduction <add>, %118, %cst_52 [1] : vector<8x8xf32> to vector<8xf32>
    %120 = vector.shape_cast %119 : vector<8xf32> to vector<8x1xf32>
    %121 = tpu.reciprocal %120 : vector<8x1xf32> -> vector<8x1xf32>
    %122 = vector.broadcast %121 : vector<8x1xf32> to vector<8x8xf32>
    %123 = arith.mulf %118, %122 : vector<8x8xf32>
    %124 = arith.addf %105, %123 : vector<8x8xf32>
    %125 = arith.truncf %123 : vector<8x8xf32> to vector<8x8xbf16>
    %cst_53 = arith.constant dense<0.000000e+00> : vector<8x4xf32>
    %126 = tpu.matmul %125, %112, %cst_53 {dimension_numbers = #tpu.dot_dimension_numbers<[1], [0], [0], [1], [0, 0, 1, 1], [], []>} : vector<8x8xbf16>, vector<8x4xbf16>, vector<8x4xf32> -> vector<8x4xf32>
    %127 = arith.truncf %126 : vector<8x4xf32> to vector<8x4xbf16>
    %c0_54 = arith.constant 0 : index
    %c20_55 = arith.constant 20 : index
    %128 = vector.load %arg12[%c0_54, %c20_55] : memref<8x32xbf16, #tpu.memory_space<vmem>>, vector<8x4xbf16>
    tpu.vector_store %arg12[%c0_54, %c20_55], %127 {strides = array<i32>} : memref<8x32xbf16, #tpu.memory_space<vmem>>, vector<8x4xbf16>,
    %129 = vector.extract_strided_slice %13 {offsets = [0, 24], sizes = [8, 4], strides = [1, 1]} : vector<8x32xbf16> to vector<8x4xbf16>
    %c0_56 = arith.constant 0 : index
    %c24 = arith.constant 24 : index
    %130 = vector.load %arg11[%c0_56, %c24] : memref<8x64xbf16, #tpu.memory_space<vmem>>, vector<8x4xbf16>
    %c0_57 = arith.constant 0 : index
    %c56 = arith.constant 56 : index
    %131 = vector.load %arg11[%c0_57, %c56] : memref<8x64xbf16, #tpu.memory_space<vmem>>, vector<8x4xbf16>
    %cst_58 = arith.constant dense<0.000000e+00> : vector<8x8xf32>
    %132 = tpu.matmul %129, %130, %cst_58 {dimension_numbers = #tpu.dot_dimension_numbers<[1], [1], [0], [0], [0, 0, 1, 0], [], []>} : vector<8x4xbf16>, vector<8x4xbf16>, vector<8x8xf32> -> vector<8x8xf32>
    %cst_59 = arith.constant dense<0xFF800000> : vector<8xf32>
    %133 = vector.multi_reduction <maximumf>, %132, %cst_59 [1] : vector<8x8xf32> to vector<8xf32>
    %134 = vector.shape_cast %133 : vector<8xf32> to vector<8x1xf32>
    %135 = vector.broadcast %134 : vector<8x1xf32> to vector<8x8xf32>
    %136 = arith.subf %132, %135 : vector<8x8xf32>
    %137 = math.exp %136 : vector<8x8xf32>
    %cst_60 = arith.constant dense<0.000000e+00> : vector<8xf32>
    %138 = vector.multi_reduction <add>, %137, %cst_60 [1] : vector<8x8xf32> to vector<8xf32>
    %139 = vector.shape_cast %138 : vector<8xf32> to vector<8x1xf32>
    %140 = tpu.reciprocal %139 : vector<8x1xf32> -> vector<8x1xf32>
    %141 = vector.broadcast %140 : vector<8x1xf32> to vector<8x8xf32>
    %142 = arith.mulf %137, %141 : vector<8x8xf32>
    %143 = arith.addf %124, %142 : vector<8x8xf32>
    %144 = arith.truncf %142 : vector<8x8xf32> to vector<8x8xbf16>
    %cst_61 = arith.constant dense<0.000000e+00> : vector<8x4xf32>
    %145 = tpu.matmul %144, %131, %cst_61 {dimension_numbers = #tpu.dot_dimension_numbers<[1], [0], [0], [1], [0, 0, 1, 1], [], []>} : vector<8x8xbf16>, vector<8x4xbf16>, vector<8x4xf32> -> vector<8x4xf32>
    %146 = arith.truncf %145 : vector<8x4xf32> to vector<8x4xbf16>
    %c0_62 = arith.constant 0 : index
    %c24_63 = arith.constant 24 : index
    %147 = vector.load %arg12[%c0_62, %c24_63] : memref<8x32xbf16, #tpu.memory_space<vmem>>, vector<8x4xbf16>
    tpu.vector_store %arg12[%c0_62, %c24_63], %146 {strides = array<i32>} : memref<8x32xbf16, #tpu.memory_space<vmem>>, vector<8x4xbf16>,
    %148 = vector.extract_strided_slice %13 {offsets = [0, 28], sizes = [8, 4], strides = [1, 1]} : vector<8x32xbf16> to vector<8x4xbf16>
    %c0_64 = arith.constant 0 : index
    %c28 = arith.constant 28 : index
    %149 = vector.load %arg11[%c0_64, %c28] : memref<8x64xbf16, #tpu.memory_space<vmem>>, vector<8x4xbf16>
    %c0_65 = arith.constant 0 : index
    %c60 = arith.constant 60 : index
    %150 = vector.load %arg11[%c0_65, %c60] : memref<8x64xbf16, #tpu.memory_space<vmem>>, vector<8x4xbf16>
    %cst_66 = arith.constant dense<0.000000e+00> : vector<8x8xf32>
    %151 = tpu.matmul %148, %149, %cst_66 {dimension_numbers = #tpu.dot_dimension_numbers<[1], [1], [0], [0], [0, 0, 1, 0], [], []>} : vector<8x4xbf16>, vector<8x4xbf16>, vector<8x8xf32> -> vector<8x8xf32>
    %cst_67 = arith.constant dense<0xFF800000> : vector<8xf32>
    %152 = vector.multi_reduction <maximumf>, %151, %cst_67 [1] : vector<8x8xf32> to vector<8xf32>
    %153 = vector.shape_cast %152 : vector<8xf32> to vector<8x1xf32>
    %154 = vector.broadcast %153 : vector<8x1xf32> to vector<8x8xf32>
    %155 = arith.subf %151, %154 : vector<8x8xf32>
    %156 = math.exp %155 : vector<8x8xf32>
    %cst_68 = arith.constant dense<0.000000e+00> : vector<8xf32>
    %157 = vector.multi_reduction <add>, %156, %cst_68 [1] : vector<8x8xf32> to vector<8xf32>
    %158 = vector.shape_cast %157 : vector<8xf32> to vector<8x1xf32>
    %159 = tpu.reciprocal %158 : vector<8x1xf32> -> vector<8x1xf32>
    %160 = vector.broadcast %159 : vector<8x1xf32> to vector<8x8xf32>
    %161 = arith.mulf %156, %160 : vector<8x8xf32>
    %162 = arith.addf %143, %161 : vector<8x8xf32>
    %163 = arith.truncf %161 : vector<8x8xf32> to vector<8x8xbf16>
    %cst_69 = arith.constant dense<0.000000e+00> : vector<8x4xf32>
    %164 = tpu.matmul %163, %150, %cst_69 {dimension_numbers = #tpu.dot_dimension_numbers<[1], [0], [0], [1], [0, 0, 1, 1], [], []>} : vector<8x8xbf16>, vector<8x4xbf16>, vector<8x4xf32> -> vector<8x4xf32>
    %165 = arith.truncf %164 : vector<8x4xf32> to vector<8x4xbf16>
    %c0_70 = arith.constant 0 : index
    %c28_71 = arith.constant 28 : index
    %166 = vector.load %arg12[%c0_70, %c28_71] : memref<8x32xbf16, #tpu.memory_space<vmem>>, vector<8x4xbf16>
    tpu.vector_store %arg12[%c0_70, %c28_71], %165 {strides = array<i32>} : memref<8x32xbf16, #tpu.memory_space<vmem>>, vector<8x4xbf16>,
    %c0_72 = arith.constant 0 : index
    %c0_73 = arith.constant 0 : index
    %167 = vector.load %arg12[%c0_72, %c0_73] : memref<8x32xbf16, #tpu.memory_space<vmem>>, vector<8x32xbf16>
    %c0_74 = arith.constant 0 : index
    %c0_75 = arith.constant 0 : index
    %168 = vector.load %arg7[%c0_74, %c0_75] : memref<32x32xbf16, #tpu.memory_space<vmem>>, vector<32x32xbf16>
    %cst_76 = arith.constant dense<0.000000e+00> : vector<8x32xf32>
    %169 = tpu.matmul %167, %168, %cst_76 {dimension_numbers = #tpu.dot_dimension_numbers<[1], [0], [0], [1], [0, 0, 1, 1], [], []>} : vector<8x32xbf16>, vector<32x32xbf16>, vector<8x32xf32> -> vector<8x32xf32>
    %c0_77 = arith.constant 0 : index
    %c0_78 = arith.constant 0 : index
    %170 = vector.load %arg8[%c0_77, %c0_78] : memref<1x32xf32, #tpu.memory_space<vmem>>, vector<1x32xf32>
    %171 = vector.broadcast %170 : vector<1x32xf32> to vector<8x32xf32>
    %172 = arith.addf %169, %171 : vector<8x32xf32>
    %c0_79 = arith.constant 0 : index
    %c0_80 = arith.constant 0 : index
    %c0_81 = arith.constant 0 : index
    %173 = vector.load %arg9[%c0_79, %c0_80, %c0_81] : memref<1x8x32xf32, #tpu.memory_space<vmem>>, vector<1x8x32xf32>
    %174 = vector.shape_cast %173 : vector<1x8x32xf32> to vector<8x32xf32>
    %175 = vector.shape_cast %172 : vector<8x32xf32> to vector<1x8x32xf32>
    tpu.vector_store %arg9[%c0_79, %c0_80, %c0_81], %175 {strides = array<i32>} : memref<1x8x32xf32, #tpu.memory_space<vmem>>, vector<1x8x32xf32>,
    %cst_82 = arith.constant 1.250000e-01 : f32
    %176 = vector.broadcast %cst_82 : f32 to vector<8x8xf32>
    %177 = arith.mulf %162, %176 : vector<8x8xf32>
    %c0_83 = arith.constant 0 : index
    %c0_84 = arith.constant 0 : index
    %c0_85 = arith.constant 0 : index
    %178 = vector.load %arg10[%c0_83, %c0_84, %c0_85] : memref<1x8x8xf32, #tpu.memory_space<vmem>>, vector<1x8x8xf32>
    %179 = vector.shape_cast %178 : vector<1x8x8xf32> to vector<8x8xf32>
    %180 = vector.shape_cast %177 : vector<8x8xf32> to vector<1x8x8xf32>
    tpu.vector_store %arg10[%c0_83, %c0_84, %c0_85], %180 {strides = array<i32>} : memref<1x8x8xf32, #tpu.memory_space<vmem>>, vector<1x8x8xf32>,
    return
  }
  func.func @transform_0(%arg0: i32, %arg1: i32) -> (i32, i32, i32) {
    %c0_i32 = arith.constant 0 : i32
    %c0_i32_0 = arith.constant 0 : i32
    %c0_i32_1 = arith.constant 0 : i32
    return %arg0, %c0_i32, %c0_i32_0 : i32, i32, i32
  }
  func.func @transform_1(%arg0: i32, %arg1: i32) -> (i32, i32) {
    %c0_i32 = arith.constant 0 : i32
    %c0_i32_0 = arith.constant 0 : i32
    %c0_i32_1 = arith.constant 0 : i32
    return %c0_i32, %c0_i32_0 : i32, i32
  }
  func.func @transform_2(%arg0: i32, %arg1: i32) -> (i32, i32) {
    %c0_i32 = arith.constant 0 : i32
    %c0_i32_0 = arith.constant 0 : i32
    %c0_i32_1 = arith.constant 0 : i32
    return %c0_i32, %c0_i32_0 : i32, i32
  }
  func.func @transform_3(%arg0: i32, %arg1: i32) -> (i32, i32) {
    %c0_i32 = arith.constant 0 : i32
    %c0_i32_0 = arith.constant 0 : i32
    %c0_i32_1 = arith.constant 0 : i32
    return %c0_i32, %c0_i32_0 : i32, i32
  }
  func.func @transform_4(%arg0: i32, %arg1: i32) -> (i32, i32) {
    %c0_i32 = arith.constant 0 : i32
    %c0_i32_0 = arith.constant 0 : i32
    %c0_i32_1 = arith.constant 0 : i32
    return %c0_i32, %c0_i32_0 : i32, i32
  }
  func.func @transform_5(%arg0: i32, %arg1: i32) -> (i32, i32) {
    %c0_i32 = arith.constant 0 : i32
    %c0_i32_0 = arith.constant 0 : i32
    %c0_i32_1 = arith.constant 0 : i32
    return %c0_i32, %c0_i32_0 : i32, i32
  }
  func.func @transform_6(%arg0: i32, %arg1: i32) -> (i32, i32) {
    %c0_i32 = arith.constant 0 : i32
    %c0_i32_0 = arith.constant 0 : i32
    %c0_i32_1 = arith.constant 0 : i32
    return %c0_i32, %c0_i32_0 : i32, i32
  }
  func.func @transform_7(%arg0: i32, %arg1: i32) -> (i32, i32, i32) {
    %c0_i32 = arith.constant 0 : i32
    %c0_i32_0 = arith.constant 0 : i32
    return %arg0, %arg1, %c0_i32 : i32, i32, i32
  }
  func.func @transform_8(%arg0: i32, %arg1: i32) -> (i32, i32, i32) {
    %c0_i32 = arith.constant 0 : i32
    %c0_i32_0 = arith.constant 0 : i32
    return %arg0, %arg1, %c0_i32 : i32, i32, i32
  }
}

</mosaic_0001>

<bundles_post_ra>
// kernel: tpu_custom_call.1
= control target key start
LH: loop header
LB: loop body
LE: loop exit
PB: predicated region body
PF: predicated region fallthrough
CT: control target
= control target key end

     0   :  { %s2911_s0 = inlined_call_operand.hbm [shape: bf16[2,8,32], index: 0, kind: input, shape index: {}]   ;;  %s2912_s1 = inlined_call_operand.hbm [shape: bf16[32,32], index: 1, kind: input, shape index: {}]   ;;  %s2913_s2 = inlined_call_operand.vmem [shape: f32[1,32], index: 2, kind: input, shape index: {}]   ;;  %s2914_s3 = inlined_call_operand.hbm [shape: bf16[32,64], index: 3, kind: input, shape index: {}]   ;;  %s2915_s4 = inlined_call_operand.vmem [shape: f32[1,64], index: 4, kind: input, shape index: {}]   ;;  %s2916_s5 = inlined_call_operand.hbm [shape: bf16[32,32], index: 5, kind: input, shape index: {}]   ;;  %s2917_s6 = inlined_call_operand.vmem [shape: f32[1,32], index: 6, kind: input, shape index: {}]   ;;  %s2918_s7 = inlined_call_operand.hbm [shape: f32[2,8,32], index: 7, kind: output, shape index: {0}]   ;;  %s2919_s8 = inlined_call_operand.hbm [shape: f32[2,8,8], index: 8, kind: output, shape index: {1}]  }
   0x1   :  { %2925 = sst [smem:[#allocation21_spill]] %s2912_s1 }
   0x2   :  { %2926 = sst [smem:[#allocation22_spill]] %s2914_s3 }
   0x3   :  { %2927 = sst [smem:[#allocation23_spill]] %s2916_s5 }
   0x4   :  { %14 = vsyncpa [#allocation5], 0 }
   0x5   :  { %16 = vsyncpa [#allocation5 + $0x1], 0 }
   0x6   :  { %17 = vsyncpa [#allocation8], 0 }
   0x7   :  { %18 = vsyncpa [#allocation11], 0 }
   0x8   :  { %19 = vsyncpa [#allocation6], 0 }
   0x9   :  { %21 = vsyncpa [#allocation6 + $0x1], 0 }
   0xa   :  { %22 = vsyncpa [#allocation14], 0 }
   0xb   :  { %24 = vsyncpa [#allocation14 + $0x1], 0  ;;  %s2481_s27 = smov 0   ;;  %s2483_s28 = smov 0  }
   0xc   :  { %s2485_s29 = smov 0   ;;  %s2487_s30 = smov 0  }
   0xd   :  { %s2489_s9 = smov 0   ;;  %s2491_s10 = smov 0  }
   0xe LB: > { %s1775_s11 = sadd.s32 4294967295, %s2402_s10   ;;  %s1776_s12 = sadd.s32 4294967294, %s2402_s10   ;;  %s2402_s10 = sphi %s2491_s10, %s30_s10   ;;  %s2398_s9 = sphi %s2489_s9, %s2950_s9   ;;  %s2394_s30 = sphi %s2487_s30, %s2949_s30   ;;  %s2390_s29 = sphi %s2485_s29, %s2948_s29   ;;  %s2386_s28 = sphi %s2483_s28, %s2947_s28   ;;  %s2382_s27 = sphi %s2481_s27, %s2946_s27  }
   0xf   : > { %p62_p0 = scmp.ne.s32.totalorder %s2386_s28, %s2382_s27  ;;  %p2515_p1 = scmp.eq.s32.totalorder %s1775_s11, 0 }
  0x10   : > { %p2519_p2 = scmp.eq.s32.totalorder %s1775_s11, 1  ;;  %p220_p3 = scmp.eq.s32.totalorder %s1776_s12, 1 }
  0x11   : > { %s2928_s13 = scalar_select %p2515_p1, 1, 0 }
  0x12   : > { %p2525_p4 = por %p2515_p1, %p62_p0  ;;  %p1777_p5 = scmp.ge.s32.totalorder %s2402_s10, 1 }
  0x13   : > { %p2530_p6 = por %p220_p3, %p62_p0  ;;  %p255_p7 = scmp.lt.s32.totalorder %s2402_s10, 3 }
  0x14   : > { %s2930_s15 = scalar_select %p2525_p4, 1, 0 }
  0x15   : > { %s2931_s16 = scalar_select %p2530_p6, 1, 0 }
  0x16   : > { %p2535_p8 = pnand %p1777_p5, %p255_p7  ;;  %s2404_s18 = smov [#allocation7]  }
  0x17   : > { %s267_s19 = sshll.u32 %s2404_s18, 4  ;;  %s2405_s21 = smov [#allocation9]   ;;  %s268_s19 = int_to_ptr.vmem [resolvable:$true] %s267_s19 }
  0x18   : > { %s2932_s17 = scalar_select %p2535_p8, 1, 0 }
  0x19   : > { %p2026_p9 = pneg %p2535_p8  ;;  %s283_s22 = sshll.u32 %s2405_s21, 4  ;;  %s284_s22 = int_to_ptr.vmem [resolvable:$true] %s283_s22 }
  0x1a   : > { %s2406_s23 = smov [#allocation10]   ;;  %s2189_s25 = scalar_lea.vmem %s268_s19, 256 }
  0x1b   : > { %p2544_p11 = pnand %p2026_p9, %p2515_p1  ;;  %s299_s24 = sshll.u32 %s2406_s23, 4  ;;  %s300_s24 = int_to_ptr.vmem [resolvable:$true] %s299_s24 }
  0x1c   : > { %p2190_p13 = scmp.ne.s32.totalorder %s268_s19, %s2189_s25  ;;  %p2197_p5 = scmp.lt.s32.totalorder %s268_s19, %s268_s19 }
  0x1d   : > { %p2180_p12 = pneg %p2544_p11  ;;  %p2198_p7 = scmp.lt.s32.totalorder %s2189_s25, %s2189_s25 }
  0x1f   : > { %p2192_p0 = pnand %p2190_p13, %p2180_p12  ;;  %p2199_p9 = por %p2198_p7, %p2197_p5 }
  0x21   : > { %p2193_p3 = pneg %p2192_p0 }
  0x23   : > { %p2200_p10 = pnand %p2199_p9, %p2193_p3 }
  0x25   : > { %2203 = shalt.err (!%p2200_p10)
}
  0x26   : > { %s2407_s26 = smov 64   ;;  %s2408_s11 = smov 4  }
  0x27   : > { %s2934_s1 = sld [smem:[#allocation21_spill]]  ;;  %s2215_s21 = scalar_lea.vmem %s284_s22, 256 }
  0x28   : > { %p2216_p6 = scmp.ne.s32.totalorder %s284_s22, %s2215_s21  ;;  %p2223_p1 = scmp.lt.s32.totalorder %s284_s22, %s284_s22 }
  0x29   : > { %p2224_p4 = scmp.lt.s32.totalorder %s2215_s21, %s2215_s21 }
  0x2a   : > { %p2218_p13 = pnand %p2216_p6, %p2180_p12 }
  0x2b   : > { %p2225_p5 = por %p2224_p4, %p2223_p1 }
  0x2c   : > { %p2219_p0 = pneg %p2218_p13 }
  0x2d   : > { %2029 = dma.hbm_to_vmem [thread:$0]  (!%p2544_p11), %s2934_s1, 256, %s268_s19, [#allocation8], %s2407_s26, %s2407_s26, %s2408_s11  }
  0x2e   : > { %p2226_p3 = pnand %p2225_p5, %p2219_p0 }
  0x30   : > { %2229 = shalt.err (!%p2226_p3)
}
  0x31   : > { %s2935_s3 = sld [smem:[#allocation22_spill]]  ;;  %s2241_s19 = scalar_lea.vmem %s300_s24, 256 }
  0x32   : > { %p2242_p10 = scmp.ne.s32.totalorder %s300_s24, %s2241_s19  ;;  %p2249_p9 = scmp.lt.s32.totalorder %s300_s24, %s300_s24 }
  0x33   : > { %p2250_p13 = scmp.lt.s32.totalorder %s2241_s19, %s2241_s19 }
  0x34   : > { %p2244_p7 = pnand %p2242_p10, %p2180_p12 }
  0x35   : > { %p2251_p8 = por %p2250_p13, %p2249_p9 }
  0x36   : > { %p2245_p6 = pneg %p2244_p7 }
  0x37   : > { %2032 = dma.hbm_to_vmem [thread:$0]  (!%p2544_p11), %s2935_s3, 256, %s284_s22, [#allocation8], %s2407_s26, %s2407_s26, %s2408_s11  }
  0x38   : > { %p2252_p1 = pnand %p2251_p8, %p2245_p6 }
  0x3a   : > { %2255 = shalt.err (!%p2252_p1)
}
  0x3b   : > { %s2936_s5 = sld [smem:[#allocation23_spill]]  ;;  %s49_s22 = sadd.s32 1, %s2390_s29 }
  0x3c   : > { %s42_s21 = sadd.s32 1, %s2398_s9  ;;  %p56_p4 = scmp.ne.s32.totalorder %s2390_s29, %s2386_s28 }
  0x3d   : > { %p44_p8 = scmp.ge.s32.totalorder %s42_s21, 2  ;;  %p57_p12 = scmp.eq.s32.totalorder %s2402_s10, 0 }
  0x3e   : > { %p2581_p0 = por %p2519_p2, %p56_p4  ;;  %p2050_p5 = scmp.lt.s32.totalorder %s2402_s10, 2 }
  0x3f   : > { %s2952_s21 = smov (%p44_p8, %s42_s21), 0  ;;  %p58_p3 = por %p57_p12, %p56_p4 }
  0x40   : > { %2938 = sst [smem:[#allocation20_spill]] %s2952_s21  ;;  %s316_s23 = sand.u32 1, %s2390_s29  }
  0x41   : > { %2035 = dma.hbm_to_vmem [thread:$0]  (!%p2544_p11), %s2936_s5, 256, %s300_s24, [#allocation11], %s2407_s26, %s2407_s26, %s2408_s11  }
  0x42   : > { %s46_s25 = ssub.s32 %s2398_s9, %s2952_s21  ;;  %s1782_s24 = sshll.u32 %s316_s23, 2 }
  0x43   : > { %p47_p10 = scmp.eq.s32.totalorder %s46_s25, 0  ;;  %s1783_s26 = sshll.u32 %s2398_s9, 6 }
  0x44   : > { %s325_s14 = scalar_lea.hbm %s2911_s0, %s1783_s26  ;;  %s320_s18 = scalar_lea.vmem [#allocation4], %s1782_s24 }
  0x45   : > { %s2593_s11 = scalar_select %p47_p10, %s2390_s29, %s49_s22  }
  0x46   : > { %s327_s1 = sshll.u32 %s320_s18, 4  ;;  %p2600_p2 = pnand %p2050_p5, %p58_p3  ;;  %s328_s1 = int_to_ptr.vmem [resolvable:$true] %s327_s1 }
  0x47   : > { %s317_s5 = scalar_lea.sflag [#allocation5], %s316_s23  ;;  %s2269_s25 = scalar_lea.vmem %s328_s1, 64 }
  0x48   : > { %p2258_p11 = pneg %p2600_p2  ;;  %p2270_p7 = scmp.ne.s32.totalorder %s328_s1, %s2269_s25 }
  0x49   : > { %s2409_s22 = smov [#allocation4]  }
  0x4a   : > { %p2272_p6 = pnand %p2270_p7, %p2258_p11  ;;  %s2274_s21 = sshll.u32 %s2409_s22, 4  ;;  %s2275_s21 = int_to_ptr.vmem [resolvable:$false] %s2274_s21 }
  0x4b   : > { %s2276_s26 = scalar_lea.vmem %s2275_s21, 128  ;;  %p2277_p13 = scmp.lt.s32.totalorder %s328_s1, %s2275_s21 }
  0x4c   : > { %p2273_p9 = pneg %p2272_p6  ;;  %p2278_p1 = scmp.lt.s32.totalorder %s2276_s26, %s2269_s25 }
  0x4e   : > { %p2279_p4 = por %p2278_p1, %p2277_p13 }
  0x50   : > { %p2280_p8 = pnand %p2279_p4, %p2273_p9 }
  0x52   : > { %2283 = shalt.err (!%p2280_p8)
}
  0x53   : > { %2039 = dma.hbm_to_vmem [thread:$0]  (!%p2600_p2), %s325_s14, 64, %s328_s1, %s317_s5  }
  0x54   : > { %p2940_p12 = scmp.ne.s32.totalorder %s2932_s17, 0 }
  0x55   : > { %s2611_s23 = sand.u32 (!%p2940_p12), 1, %s2386_s28   ;;  %p2941_p5 = scmp.ne.s32.totalorder (!%p2940_p12), %s2930_s15, 0 }
  0x56   : > { %336 = sbr.rel (%p2940_p12) target bundleno = 1570 (0x622), region = 48  ;;  %s1785_s24 = sshll.u32 (!%p2940_p12), %s2611_s23, 2 }
  0x57   : > { %s339_s19 = scalar_lea.sflag (!%p2940_p12), [#allocation5], %s2611_s23  ;;  %s342_s12 = scalar_lea.vmem (!%p2940_p12), [#allocation4], %s1785_s24 }
  0x5b   : > { %2361 = dma.done.wait (%p2941_p5), %s339_s19, 64  }
  0x5c   : > { %2363 = vsyncadd (%p2941_p5), %s339_s19, 4294967232  ;;  %p2942_p3 = scmp.ne.s32.totalorder %s2928_s13, 0 }
  0x5e   : > { %2365 = dma.done.wait (%p2942_p3), [#allocation8], 512  }
  0x5f   : > { %2367 = vsyncadd (%p2942_p3), [#allocation8], 4294966784 }
  0x60   : > { %2369 = dma.done.wait (%p2942_p3), [#allocation11], 256  }
  0x61   : > { %2371 = vsyncadd (%p2942_p3), [#allocation11], 4294967040  ;;  %v2410_v0 = vmov 0.0   ;;  %vm2411_vm0 = vmmov 0   ;;  %v2132_v1 = vld [vmem:[#allocation9 + $0x8] sm:$0xff]   ;;  %v2133_v2 = vld [vmem:[#allocation9] sm:$0xff]  }
  0x62   : > { %1888 = vmatprep.subr.bf16.mxu0 %v2410_v0  ;;  %1892 = vmatprep.mubr.msk.bf16.mxu0 %vm2411_vm0, %v2410_v0  ;;  %v2134_v3 = vld [vmem:[#allocation7 + $0x8] sm:$0xff]   ;;  %v2135_v4 = vld [vmem:[#allocation7] sm:$0xff]   ;;  %v397_v5 = vld [vmem:[%s342_s12] sm:$0xf]  ;;  %vm421_vm1 = vcmask 261120   ;;  %vm466_vm2 = vcmask 519168  }
  0x63   : > { %1896 = vmatprep.subr.bf16.mxu1 %v2410_v0  ;;  %1900 = vmatprep.mubr.msk.bf16.mxu1 %vm2411_vm0, %v2410_v0  ;;  %v473_v6 = vld [vmem:[%s342_s12] sm:$0xf]  ;;  %v1791_v7 = vld [vmem:[%s2915_s4] ss:$0 sm:$0xff]  ;;  %vm543_vm3 = vcmask 31744   ;;  %s2412_s15 = smov 120  }
  0x64   : > { %1889 = vmatpush3.bf16.msra.mxu0 %v2132_v1  ;;  %1897 = vmatpush3.bf16.msra.mxu1 %v2134_v3  ;;  %v1795_v16 = vld [vmem:[%s2913_s2] ss:$0 sm:$0xff]  ;;  %s2413_s17 = smov 124   ;;  %s2414_s21 = smov 116   ;;  %vm590_vm4 = vcmask 64512   ;;  %vm612_vm5 = vcmask 1043456  }
  0x65   : > { %1890 = vmatprep.subr.bf16.mxu0 %v2410_v0  ;;  %1898 = vmatprep.subr.bf16.mxu1 %v2410_v0  ;;  %s2415_s14 = smov 112   ;;  %s2416_s18 = smov 108   ;;  %vm657_vm6 = vcmask 27648   ;;  %vm782_vm7 = vcmask 60448   ;;  %vm906_vm8 = vcmask 93248   ;;  %vm1030_vm9 = vcmask 126048  }
  0x66   : > { %s2417_s25 = smov 104   ;;  %s2418_s22 = smov 100   ;;  %vm1154_vm10 = vcmask 158848   ;;  %vm1278_vm11 = vcmask 191648   ;;  %vm1402_vm12 = vcmask 224448   ;;  %vm1526_vm13 = vcmask 257248  }
  0x67   : > { %s2419_s26 = smov 92   ;;  %s2420_s24 = smov 96  }
  0x68   : > { %1891 = vmatpush3.bf16.msra.mxu0 %v2133_v2  ;;  %1899 = vmatpush3.bf16.msra.mxu1 %v2135_v4  ;;  %s2421_s19 = smov 88   ;;  %s2422_s12 = smov 84  }
  0x69   : > { %1904 = vmatprep.subr.bf16.mxu0 %v2410_v0  ;;  %1910 = vmatprep.subr.bf16.mxu1 %v2410_v0  ;;  %s2423_s1 = smov 76   ;;  %s2424_s3 = smov 72  }
  0x6a   : > { %s2425_s5 = smov 68   ;;  %s2426_s13 = smov 80  }
  0x6b   : > { %1893 = vmatmul.mubr.msk.bf16.vlgmr.msra.gmra.mxu0 %vm421_vm1, %v397_v5  ;;  %1901 = vmatmul.mubr.msk.bf16.vlgmr.msra.gmra.mxu1 %vm421_vm1, %v473_v6 }
  0x6c   : > { %1906 = vmatprep.mubr.msk.bf16.mxu0 %vm2411_vm0, %v2410_v0  ;;  %1912 = vmatprep.mubr.msk.bf16.mxu1 %vm2411_vm0, %v2410_v0 }
 0x12b   : > { %v459_v8 = vpop.f32.mrf.mxu0  ;;  %v535_v12 = vpop.f32.mrf.mxu1 }
 0x12c   : > { %v460_v9 = vadd.f32 %v1791_v7, %v459_v8  ;;  %v536_v19 = vadd.f32 %v1795_v16, %v535_v12 }
 0x12d   : > { %v1894_v10 = vpop.f32.mrf.mxu0  ;;  %v1902_v14 = vpop.f32.mrf.mxu1 }
 0x12e   : > { %v465_v11 = vpack.c.bf16 %v460_v9, %v460_v9  ;;  %v541_v24 = vpack.c.bf16 %v536_v19, %v536_v19 }
 0x12f   : > { %v462_v13 = vpop.f32.mrf.mxu0  ;;  %v538_v17 = vpop.f32.mrf.mxu1 }
 0x130   : > { %467 = vst.msk [vmem:[#allocation2] sm:$0xf] %vm466_vm2, %v465_v11 }
 0x131   : > { %v1895_v15 = vpop.f32.mrf.mxu0  ;;  %v1903_v18 = vpop.f32.mrf.mxu1 }
 0x137   : > { %v2649_v20 = vld [vmem:[#allocation2] sm:$0xf] }
 0x138   : > { %v2651_v21 = vld [vmem:[#allocation2] ss:$0 sps:$4 sm:$0xff]   ;;  %v548_v22 = vsel %vm543_vm3, %v2649_v20, 0 }
 0x139   : > { %v2655_v23 = vld [vmem:[#allocation2] ss:$0 sps:$4 sm:$0xff]   ;;  %1905 = vmatpush3.bf16.xpose.msra.mxu0 %v548_v22  ;;  %790 = vrot.lane.b32.xlu1 %v2651_v21, %s2412_s15 }
 0x13a   : > { %666 = vrot.lane.b32.xlu0 %v2655_v23, %s2413_s17  ;;  %1916 = vmatprep.subr.bf16.mxu0 %v2410_v0  ;;  %v2661_v25 = vld [vmem:[#allocation2] ss:$0 sps:$4 sm:$0xff]  }
 0x13b   : > { %v2666_v26 = vld [vmem:[#allocation2] ss:$0 sps:$4 sm:$0xff]  }
 0x13c   : > { %v2669_v27 = vld [vmem:[#allocation2] ss:$0 sps:$4 sm:$0xff]  }
 0x13d   : > { %785 = vrot.lane.b32.xlu1 %v541_v24, %s2412_s15  ;;  %v2672_v28 = vld [vmem:[#allocation2] ss:$0 sps:$4 sm:$0xff]   ;;  %s1789_s15 = sshll.u32 %s2611_s23, 3 }
 0x13e   : > { %661 = vrot.lane.b32.xlu0 %v541_v24, %s2413_s17  ;;  %v2675_v29 = vld [vmem:[#allocation2] ss:$0 sps:$4 sm:$0xff]   ;;  %s2821_s17 = scalar_lea.vmem [#allocation13], %s1789_s15 }
 0x140   : > { %1907 = vmatmul.mubr.msk.bf16.vlgmr.msra.gmra.mxu0 %vm543_vm3, %v541_v24 }
 0x141   : > { %909 = vrot.lane.b32.xlu1 %v541_v24, %s2414_s21  ;;  %1918 = vmatprep.mubr.msk.bf16.mxu0 %vm2411_vm0, %v2410_v0 }
 0x142   : > { %914 = vrot.lane.b32.xlu0 %v2661_v25, %s2414_s21  ;;  %s2427_s21 = smov 4  }
 0x145   : > { %1033 = vrot.lane.b32.xlu1 %v541_v24, %s2415_s14 }
 0x146   : > { %1038 = vrot.lane.b32.xlu0 %v2666_v26, %s2415_s14  ;;  %s2428_s14 = smov 8  }
 0x149   : > { %1157 = vrot.lane.b32.xlu1 %v541_v24, %s2416_s18 }
 0x14a   : > { %1162 = vrot.lane.b32.xlu0 %v2669_v27, %s2416_s18  ;;  %s2429_s18 = smov 12  }
 0x14d   : > { %1281 = vrot.lane.b32.xlu1 %v541_v24, %s2417_s25 }
 0x14e   : > { %1286 = vrot.lane.b32.xlu0 %v2672_v28, %s2417_s25  ;;  %s2430_s25 = smov 16  }
 0x151   : > { %1405 = vrot.lane.b32.xlu1 %v541_v24, %s2418_s22 }
 0x152   : > { %1410 = vrot.lane.b32.xlu0 %v2675_v29, %s2418_s22  ;;  %s2431_s22 = smov 20  }
 0x1ab   : > { %v791_v32 = vpop.permute.xlu1 %790 }
 0x1ac   : > { %v667_v30 = vpop.permute.xlu0 %666  ;;  %v796_v34 = vsel %vm543_vm3, %v791_v32, 0 }
 0x1ad   : > { %v672_v31 = vsel %vm543_vm3, %v667_v30, 0 }
 0x1ae   : > { %1917 = vmatpush3.bf16.xpose.msra.mxu0 %v672_v31 }
 0x1af   : > { %1928 = vmatprep.subr.bf16.mxu0 %v2410_v0  ;;  %v786_v36 = vpop.permute.xlu1 %785 }
 0x1b0   : > { %v662_v33 = vpop.permute.xlu0 %661 }
 0x1b3   : > { %v910_v39 = vpop.permute.xlu1 %909 }
 0x1b4   : > { %v915_v35 = vpop.permute.xlu0 %914 }
 0x1b5   : > { %1919 = vmatmul.mubr.msk.bf16.vlgmr.msra.gmra.mxu0 %vm543_vm3, %v662_v33  ;;  %v920_v37 = vsel %vm543_vm3, %v915_v35, 0  ;;  %v1800_v35 = vcombine.low %v2649_v20, %v2649_v20 }
 0x1b6   : > { %1929 = vmatpush3.bf16.xpose.msra.mxu0 %v796_v34  ;;  %1930 = vmatprep.mubr.msk.bf16.mxu0 %vm2411_vm0, %v2410_v0 }
 0x1b7   : > { %1940 = vmatprep.subr.bf16.mxu0 %v2410_v0  ;;  %v1034_v42 = vpop.permute.xlu1 %1033 }
 0x1b8   : > { %v1039_v38 = vpop.permute.xlu0 %1038 }
 0x1b9   : > { %v1044_v40 = vsel %vm543_vm3, %v1039_v38, 0 }
 0x1bb   : > { %v1158_v45 = vpop.permute.xlu1 %1157 }
 0x1bc   : > { %v1163_v41 = vpop.permute.xlu0 %1162 }
 0x1bd   : > { %1931 = vmatmul.mubr.msk.bf16.vlgmr.msra.gmra.mxu0 %vm543_vm3, %v786_v36  ;;  %v1168_v43 = vsel %vm543_vm3, %v1163_v41, 0 }
 0x1be   : > { %1941 = vmatpush3.bf16.xpose.msra.mxu0 %v920_v37  ;;  %1942 = vmatprep.mubr.msk.bf16.mxu0 %vm2411_vm0, %v2410_v0 }
 0x1bf   : > { %1952 = vmatprep.subr.bf16.mxu0 %v2410_v0  ;;  %v1282_v48 = vpop.permute.xlu1 %1281 }
 0x1c0   : > { %v1287_v44 = vpop.permute.xlu0 %1286 }
 0x1c1   : > { %v1292_v46 = vsel %vm543_vm3, %v1287_v44, 0 }
 0x1c3   : > { %v1406_v50 = vpop.permute.xlu1 %1405 }
 0x1c4   : > { %v1411_v47 = vpop.permute.xlu0 %1410 }
 0x1c5   : > { %1943 = vmatmul.mubr.msk.bf16.vlgmr.msra.gmra.mxu0 %vm543_vm3, %v910_v39  ;;  %v1416_v49 = vsel %vm543_vm3, %v1411_v47, 0 }
 0x1c6   : > { %1953 = vmatpush3.bf16.xpose.msra.mxu0 %v1044_v40  ;;  %1954 = vmatprep.mubr.msk.bf16.mxu0 %vm2411_vm0, %v2410_v0 }
 0x1c7   : > { %1964 = vmatprep.subr.bf16.mxu0 %v2410_v0 }
 0x1cd   : > { %1955 = vmatmul.mubr.msk.bf16.vlgmr.msra.gmra.mxu0 %vm543_vm3, %v1034_v42 }
 0x1ce   : > { %1965 = vmatpush3.bf16.xpose.msra.mxu0 %v1168_v43  ;;  %1966 = vmatprep.mubr.msk.bf16.mxu0 %vm2411_vm0, %v2410_v0 }
 0x1cf   : > { %1976 = vmatprep.subr.bf16.mxu0 %v2410_v0 }
 0x1d5   : > { %1967 = vmatmul.mubr.msk.bf16.vlgmr.msra.gmra.mxu0 %vm543_vm3, %v1158_v45 }
 0x1d6   : > { %1977 = vmatpush3.bf16.xpose.msra.mxu0 %v1292_v46  ;;  %1978 = vmatprep.mubr.msk.bf16.mxu0 %vm2411_vm0, %v2410_v0 }
 0x1d7   : > { %1988 = vmatprep.subr.bf16.mxu0 %v2410_v0 }
 0x1dd   : > { %1979 = vmatmul.mubr.msk.bf16.vlgmr.msra.gmra.mxu0 %vm543_vm3, %v1282_v48 }
 0x1de   : > { %1989 = vmatpush3.bf16.xpose.msra.mxu0 %v1416_v49  ;;  %1990 = vmatprep.mubr.msk.bf16.mxu0 %vm2411_vm0, %v2410_v0 }
 0x1df   : > { %2000 = vmatprep.subr.bf16.mxu0 %v2410_v0 }
 0x1e5   : > { %1991 = vmatmul.mubr.msk.bf16.vlgmr.msra.gmra.mxu0 %vm543_vm3, %v1406_v50 }
 0x1e6   : > { %2004 = vmatprep.mubr.msk.bf16.mxu0 %vm2411_vm0, %v2410_v0 }
 0x200   : > { %v584_v51 = vpop.f32.mrf.mxu0 }
 0x201   : > { %v591_v52 = vsel %vm590_vm4, %v584_v51, -inf }
 0x202   : > { %592 = vmax.xlane.f32.xlu0 %v591_v52  ;;  %v1908_v53 = vpop.f32.mrf.mxu0 }
 0x204   : > { %v587_v54 = vpop.f32.mrf.mxu0 }
 0x206   : > { %v1909_v55 = vpop.f32.mrf.mxu0 }
 0x275   : > { %v708_v56 = vpop.f32.mrf.mxu0 }
 0x276   : > { %v714_v57 = vsel %vm590_vm4, %v708_v56, -inf }
 0x277   : > { %715 = vmax.xlane.f32.xlu1 %v714_v57  ;;  %v1920_v58 = vpop.f32.mrf.mxu0 }
 0x279   : > { %v711_v59 = vpop.f32.mrf.mxu0 }
 0x27b   : > { %v1921_v60 = vpop.f32.mrf.mxu0 }
 0x27d   : > { %v832_v61 = vpop.f32.mrf.mxu0 }
 0x27e   : > { %v838_v62 = vsel %vm590_vm4, %v832_v61, -inf }
 0x27f   : > { %839 = vmax.xlane.f32.xlu0 %v838_v62  ;;  %v1932_v63 = vpop.f32.mrf.mxu0 }
 0x281   : > { %v835_v1 = vpop.f32.mrf.mxu0 }
 0x283   : > { %v1933_v2 = vpop.f32.mrf.mxu0 }
 0x285   : > { %v2716_v3 = vpop.f32.mrf.mxu0 }
 0x286   : > { %v962_v4 = vsel %vm590_vm4, %v2716_v3, -inf }
 0x287   : > { %963 = vmax.xlane.f32.xlu0 %v962_v4  ;;  %v1944_v5 = vpop.f32.mrf.mxu0 }
 0x289   : > { %v959_v6 = vpop.f32.mrf.mxu0 }
 0x28b   : > { %v1945_v7 = vpop.f32.mrf.mxu0  ;;  %v593_v36 = vpop.xlane.xlu0 %592 }
 0x28c   : > { %v594_v37 = vsub.f32 %v584_v51, %v593_v36 }
 0x28d   : > { %v2720_v8 = vpop.f32.mrf.mxu0 }
 0x28e   : > { %v1086_v9 = vsel %vm590_vm4, %v2720_v8, -inf  ;;  %v595_v38 = vmul.f32 1.442695, %v594_v37 }
 0x28f   : > { %1087 = vmax.xlane.f32.xlu1 %v1086_v9  ;;  %v1956_v10 = vpop.f32.mrf.mxu0 }
 0x290   : > { %2146 = vpow2.f32 %v595_v38 }
 0x291   : > { %v1083_v11 = vpop.f32.mrf.mxu0 }
 0x293   : > { %v1957_v12 = vpop.f32.mrf.mxu0 }
 0x295   : > { %v2724_v13 = vpop.f32.mrf.mxu0 }
 0x296   : > { %v1210_v14 = vsel %vm590_vm4, %v2724_v13, -inf }
 0x297   : > { %1211 = vmax.xlane.f32.xlu0 %v1210_v14  ;;  %v1968_v15 = vpop.f32.mrf.mxu0 }
 0x299   : > { %v1207_v16 = vpop.f32.mrf.mxu0 }
 0x29b   : > { %v1969_v17 = vpop.f32.mrf.mxu0 }
 0x29d   : > { %v1328_v18 = vpop.f32.mrf.mxu0  ;;  %v2736_v40 = vpop.eup %2146 }
 0x29e   : > { %v1334_v19 = vsel %vm590_vm4, %v1328_v18, -inf  ;;  %v597_v41 = vsel %vm590_vm4, %v2736_v40, 0.0 }
 0x29f   : > { %1335 = vmax.xlane.f32.xlu1 %v1334_v19  ;;  %v1980_v22 = vpop.f32.mrf.mxu0 }
 0x2a1   : > { %v1331_v24 = vpop.f32.mrf.mxu0 }
 0x2a3   : > { %v1981_v30 = vpop.f32.mrf.mxu0 }
 0x2a5   : > { %v2729_v31 = vpop.f32.mrf.mxu0 }
 0x2a6   : > { %v1458_v39 = vsel %vm590_vm4, %v2729_v31, -inf }
 0x2a7   : > { %v1992_v32 = vpop.f32.mrf.mxu0 }
 0x2a9   : > { %v1455_v33 = vpop.f32.mrf.mxu0 }
 0x2ab   : > { %v1993_v34 = vpop.f32.mrf.mxu0 }
 0x2ad   : > { %727 = vrot.lane.b32.xlu0 %v2655_v23, %s2419_s26  ;;  %s2432_s26 = smov 24  }
 0x2b0   : > { %607 = vrot.lane.b32.xlu1 %v1800_v35, %s2420_s24  ;;  %s2433_s24 = smov 28  }
 0x2cc   : > { %1459 = vmax.xlane.f32.xlu0 %v1458_v39 }
 0x2d4   : > { %598 = vadd.xlane.f32.xlu1 %v597_v41 }
 0x300   : > { %v716_v23 = vpop.xlane.xlu1 %715 }
 0x301   : > { %v717_v42 = vsub.f32 %v708_v56, %v716_v23 }
 0x303   : > { %v718_v43 = vmul.f32 1.442695, %v717_v42 }
 0x305   : > { %2148 = vpow2.f32 %v718_v43 }
 0x308   : > { %v840_v20 = vpop.xlane.xlu0 %839 }
 0x309   : > { %v841_v44 = vsub.f32 %v832_v61, %v840_v20 }
 0x30b   : > { %v842_v45 = vmul.f32 1.442695, %v841_v44 }
 0x30d   : > { %2150 = vpow2.f32 %v842_v45 }
 0x310   : > { %v964_v53 = vpop.xlane.xlu0 %963 }
 0x311   : > { %v965_v55 = vsub.f32 %v2716_v3, %v964_v53 }
 0x312   : > { %v2740_v46 = vpop.eup %2148 }
 0x313   : > { %v720_v47 = vsel %vm590_vm4, %v2740_v46, 0.0  ;;  %v966_v56 = vmul.f32 1.442695, %v965_v55 }
 0x314   : > { %721 = vadd.xlane.f32.xlu0 %v720_v47 }
 0x315   : > { %2152 = vpow2.f32 %v966_v56 }
 0x318   : > { %v1088_v50 = vpop.xlane.xlu1 %1087 }
 0x319   : > { %v1089_v57 = vsub.f32 %v2720_v8, %v1088_v50 }
 0x31a   : > { %v2744_v48 = vpop.eup %2150 }
 0x31b   : > { %v844_v49 = vsel %vm590_vm4, %v2744_v48, 0.0 }
 0x31c   : > { %845 = vadd.xlane.f32.xlu1 %v844_v49 }
 0x320   : > { %v1212_v58 = vpop.xlane.xlu0 %1211 }
 0x321   : > { %v1213_v59 = vsub.f32 %v2724_v13, %v1212_v58 }
 0x323   : > { %v1214_v61 = vmul.f32 1.442695, %v1213_v59 }
 0x324   : > { %v728_v7 = vpop.permute.xlu0 %727 }
 0x325   : > { %v733_v17 = vsel %vm612_vm5, %v728_v7, 0 }
 0x328   : > { %v1336_v51 = vpop.xlane.xlu1 %1335 }
 0x329   : > { %v1337_v60 = vsub.f32 %v1328_v18, %v1336_v51 }
 0x32a   : > { %851 = vrot.lane.b32.xlu0 %v2651_v21, %s2421_s19  ;;  %v1090_v21 = vmul.f32 1.442695, %v1089_v57  ;;  %s1836_s19 = sshll.u32 %s2394_s30, 7 }
 0x32b   : > { %v1338_v62 = vmul.f32 1.442695, %v1337_v60 }
 0x32c   : > { %v608_v52 = vpop.permute.xlu1 %607  ;;  %2154 = vpow2.f32 %v1090_v21 }
 0x32d   : > { %v614_v54 = vsel %vm612_vm5, %v608_v52, 0  ;;  %975 = vrot.lane.b32.xlu1 %v2661_v25, %s2422_s12  ;;  %2156 = vpow2.f32 %v1214_v61  ;;  %v2755_v25 = vpop.eup %2152 }
 0x32e   : > { %1911 = vmatpush3.bf16.msra.mxu1 %v614_v54  ;;  %2158 = vpow2.f32 %v1338_v62  ;;  %v968_v63 = vsel %vm590_vm4, %v2755_v25, 0.0 }
 0x32f   : > { %1922 = vmatprep.subr.bf16.mxu1 %v2410_v0 }
 0x339   : > { %v2759_v1 = vpop.eup %2154 }
 0x33a   : > { %v2761_v2 = vpop.eup %2156  ;;  %v1092_v3 = vsel %vm590_vm4, %v2759_v1, 0.0 }
 0x33b   : > { %v2765_v4 = vpop.eup %2158  ;;  %v1216_v5 = vsel %vm590_vm4, %v2761_v2, 0.0 }
 0x33c   : > { %v1340_v6 = vsel %vm590_vm4, %v2765_v4, 0.0 }
 0x349   : > { %969 = vadd.xlane.f32.xlu0 %v968_v63 }
 0x34d   : > { %1093 = vadd.xlane.f32.xlu0 %v1092_v3 }
 0x351   : > { %1217 = vadd.xlane.f32.xlu1 %v1216_v5  ;;  %1341 = vadd.xlane.f32.xlu0 %v1340_v6 }
 0x355   : > { %v1460_v8 = vpop.xlane.xlu0 %1459 }
 0x356   : > { %v1461_v9 = vsub.f32 %v2729_v31, %v1460_v8 }
 0x358   : > { %v1462_v10 = vmul.f32 1.442695, %v1461_v9 }
 0x35a   : > { %2160 = vpow2.f32 %v1462_v10 }
 0x35d   : > { %v599_v11 = vpop.xlane.xlu1 %598 }
 0x35e   : > { %2162 = vrcp.f32 %v599_v11 }
 0x362   : > { %1223 = vrot.lane.b32.xlu1 %v2669_v27, %s2423_s1 }
 0x366   : > { %1347 = vrot.lane.b32.xlu1 %v2672_v28, %s2424_s3  ;;  %s1630_s3 = scalar_lea.hbm %s2919_s8, %s1836_s19 }
 0x367   : > { %v2774_v12 = vpop.eup %2160 }
 0x368   : > { %v1464_v13 = vsel %vm590_vm4, %v2774_v12, 0.0 }
 0x369   : > { %1465 = vadd.xlane.f32.xlu0 %v1464_v13 }
 0x36a   : > { %1471 = vrot.lane.b32.xlu1 %v2675_v29, %s2425_s5  ;;  %s1632_s5 = sshll.u32 %s2821_s17, 4  ;;  %s1633_s5 = int_to_ptr.vmem [resolvable:$true] %s1632_s5 }
 0x36b   : > { %v2163_v14 = vpop.eup %2162 }
 0x36c   : > { %v601_v15 = vmul.f32 %v2163_v14, %v2736_v40 }
 0x36e   : > { %v603_v16 = vpack.c.bf16 %v601_v15, %v601_v15 }
 0x370   : > { %1913 = vmatmul.mubr.msk.bf16.vlgmr.msra.gmra.mxu1 %vm590_vm4, %v603_v16 }
 0x371   : > { %1923 = vmatpush3.bf16.msra.mxu1 %v733_v17  ;;  %1924 = vmatprep.mubr.msk.bf16.mxu1 %vm2411_vm0, %v2410_v0 }
 0x372   : > { %1934 = vmatprep.subr.bf16.mxu1 %v2410_v0 }
 0x37f   : > { %1099 = vrot.lane.b32.xlu0 %v2666_v26, %s2426_s13  ;;  %s1604_s13 = scalar_lea.sflag [#allocation14], %s2611_s23 }
 0x39d   : > { %v722_v27 = vpop.xlane.xlu0 %721 }
 0x39e   : > { %2164 = vrcp.f32 %v722_v27 }
 0x3a1   : > { %v852_v19 = vpop.permute.xlu0 %851 }
 0x3a2   : > { %v857_v30 = vsel %vm612_vm5, %v852_v19, 0 }
 0x3a5   : > { %v846_v28 = vpop.xlane.xlu1 %845 }
 0x3a6   : > { %2166 = vrcp.f32 %v846_v28 }
 0x3a9   : > { %v976_v32 = vpop.permute.xlu1 %975 }
 0x3aa   : > { %v981_v35 = vsel %vm612_vm5, %v976_v32, 0 }
 0x3ab   : > { %v2165_v29 = vpop.eup %2164 }
 0x3ac   : > { %v724_v18 = vmul.f32 %v2165_v29, %v2740_v46 }
 0x3ae   : > { %v725_v22 = vadd.f32 %v724_v18, %v601_v15  ;;  %v726_v24 = vpack.c.bf16 %v724_v18, %v724_v18 }
 0x3b0   : > { %1925 = vmatmul.mubr.msk.bf16.vlgmr.msra.gmra.mxu1 %vm590_vm4, %v726_v24 }
 0x3b1   : > { %1935 = vmatpush3.bf16.msra.mxu1 %v857_v30  ;;  %1936 = vmatprep.mubr.msk.bf16.mxu1 %vm2411_vm0, %v2410_v0 }
 0x3b2   : > { %1946 = vmatprep.subr.bf16.mxu1 %v2410_v0 }
 0x3b3   : > { %v2167_v26 = vpop.eup %2166 }
 0x3b4   : > { %v848_v31 = vmul.f32 %v2167_v26, %v2744_v48 }
 0x3b6   : > { %v849_v33 = vadd.f32 %v848_v31, %v725_v22  ;;  %v850_v34 = vpack.c.bf16 %v848_v31, %v848_v31 }
 0x3b8   : > { %1937 = vmatmul.mubr.msk.bf16.vlgmr.msra.gmra.mxu1 %vm590_vm4, %v850_v34 }
 0x3b9   : > { %1947 = vmatpush3.bf16.msra.mxu1 %v981_v35  ;;  %1948 = vmatprep.mubr.msk.bf16.mxu1 %vm2411_vm0, %v2410_v0 }
 0x3ba   : > { %1958 = vmatprep.subr.bf16.mxu1 %v2410_v0 }
 0x3d2   : > { %v970_v36 = vpop.xlane.xlu0 %969 }
 0x3d3   : > { %2168 = vrcp.f32 %v970_v36 }
 0x3d6   : > { %v1094_v39 = vpop.xlane.xlu0 %1093 }
 0x3d7   : > { %2170 = vrcp.f32 %v1094_v39  ;;  %v2145_v39 = vld [vmem:[#allocation10] sm:$0xff]  }
 0x3da   : > { %v1218_v41 = vpop.xlane.xlu1 %1217  ;;  %v1342_v23 = vpop.xlane.xlu0 %1341 }
 0x3db   : > { %2172 = vrcp.f32 %v1218_v41 }
 0x3dc   : > { %2174 = vrcp.f32 %v1342_v23 }
 0x3de   : > { %v1224_v47 = vpop.permute.xlu1 %1223 }
 0x3df   : > { %v1229_v51 = vsel %vm612_vm5, %v1224_v47, 0 }
 0x3e0   : > { %v2169_v37 = vpop.eup %2168 }
 0x3e1   : > { %v972_v38 = vmul.f32 %v2169_v37, %v2755_v25  ;;  %v2144_v37 = vld [vmem:[#allocation10 + $0x8] sm:$0xff]  }
 0x3e2   : > { %v1348_v57 = vpop.permute.xlu1 %1347  ;;  %2001 = vmatpush3.bf16.msra.mxu0 %v2144_v37 }
 0x3e3   : > { %v974_v40 = vpack.c.bf16 %v972_v38, %v972_v38  ;;  %v973_v48 = vadd.f32 %v972_v38, %v849_v33  ;;  %v1353_v60 = vsel %vm612_vm5, %v1348_v57, 0  ;;  %2002 = vmatprep.subr.bf16.mxu0 %v2410_v0 }
 0x3e4   : > { %v2171_v42 = vpop.eup %2170 }
 0x3e5   : > { %1949 = vmatmul.mubr.msk.bf16.vlgmr.msra.gmra.mxu1 %vm590_vm4, %v974_v40  ;;  %v1096_v20 = vmul.f32 %v2171_v42, %v2759_v1 }
 0x3e6   : > { %1960 = vmatprep.mubr.msk.bf16.mxu1 %vm2411_vm0, %v2410_v0  ;;  %v1472_v25 = vpop.permute.xlu1 %1471  ;;  %2003 = vmatpush3.bf16.msra.mxu0 %v2145_v39 }
 0x3e7   : > { %v1098_v49 = vpack.c.bf16 %v1096_v20, %v1096_v20  ;;  %v1097_v52 = vadd.f32 %v1096_v20, %v973_v48  ;;  %v1477_v1 = vsel %vm612_vm5, %v1472_v25, 0 }
 0x3e8   : > { %v2173_v44 = vpop.eup %2172 }
 0x3e9   : > { %v1220_v50 = vmul.f32 %v2173_v44, %v2761_v2  ;;  %v2175_v53 = vpop.eup %2174 }
 0x3ea   : > { %v1344_v55 = vmul.f32 %v2175_v53, %v2765_v4 }
 0x3eb   : > { %v1221_v54 = vadd.f32 %v1220_v50, %v1097_v52  ;;  %v1222_v58 = vpack.c.bf16 %v1220_v50, %v1220_v50 }
 0x3ec   : > { %v1346_v63 = vpack.c.bf16 %v1344_v55, %v1344_v55 }
 0x3ed   : > { %v1345_v59 = vadd.f32 %v1344_v55, %v1221_v54 }
 0x3f2   : > { %v1466_v43 = vpop.xlane.xlu0 %1465 }
 0x3f3   : > { %2176 = vrcp.f32 %v1466_v43 }
 0x3f6   : > { %v1100_v45 = vpop.permute.xlu0 %1099 }
 0x3f7   : > { %v1105_v46 = vsel %vm612_vm5, %v1100_v45, 0 }
 0x3f8   : > { %1959 = vmatpush3.bf16.msra.mxu1 %v1105_v46 }
 0x3f9   : > { %1970 = vmatprep.subr.bf16.mxu1 %v2410_v0 }
 0x3fb   : > { %1961 = vmatmul.mubr.msk.bf16.vlgmr.msra.gmra.mxu1 %vm590_vm4, %v1098_v49 }
 0x3fc   : > { %1971 = vmatpush3.bf16.msra.mxu1 %v1229_v51  ;;  %1972 = vmatprep.mubr.msk.bf16.mxu1 %vm2411_vm0, %v2410_v0 }
 0x3fd   : > { %1982 = vmatprep.subr.bf16.mxu1 %v2410_v0 }
 0x400   : > { %v2177_v56 = vpop.eup %2176 }
 0x401   : > { %v1468_v21 = vmul.f32 %v2177_v56, %v2774_v12 }
 0x403   : > { %1973 = vmatmul.mubr.msk.bf16.vlgmr.msra.gmra.mxu1 %vm590_vm4, %v1222_v58  ;;  %v1469_v61 = vadd.f32 %v1468_v21, %v1345_v59  ;;  %v1470_v2 = vpack.c.bf16 %v1468_v21, %v1468_v21 }
 0x404   : > { %1983 = vmatpush3.bf16.msra.mxu1 %v1353_v60  ;;  %1984 = vmatprep.mubr.msk.bf16.mxu1 %vm2411_vm0, %v2410_v0 }
 0x405   : > { %1994 = vmatprep.subr.bf16.mxu1 %v2410_v0  ;;  %v1596_v62 = vmul.f32 0.125, %v1469_v61 }
 0x407   : > { %1597 = vst.msk [vmem:[%s2821_s17] sm:$0xff] %vm590_vm4, %v1596_v62 }
 0x40b   : > { %1985 = vmatmul.mubr.msk.bf16.vlgmr.msra.gmra.mxu1 %vm590_vm4, %v1346_v63 }
 0x40c   : > { %1995 = vmatpush3.bf16.msra.mxu1 %v1477_v1  ;;  %1996 = vmatprep.mubr.msk.bf16.mxu1 %vm2411_vm0, %v2410_v0 }
 0x413   : > { %1997 = vmatmul.mubr.msk.bf16.vlgmr.msra.gmra.mxu1 %vm590_vm4, %v1470_v2 }
 0x430   : > { %v650_v3 = vpop.f32.mrf.mxu1 }
 0x431   : > { %v656_v4 = vpack.c.bf16 %v650_v3, %v650_v3 }
 0x432   : > { %v1914_v5 = vpop.f32.mrf.mxu1 }
 0x433   : > { %658 = vst.msk [vmem:[#allocation3] sm:$0xf] %vm657_vm6, %v656_v4 }
 0x434   : > { %v653_v6 = vpop.f32.mrf.mxu1 }
 0x436   : > { %v1915_v7 = vpop.f32.mrf.mxu1 }
 0x470   : > { %v769_v8 = vpop.f32.mrf.mxu1 }
 0x471   : > { %v1840_v9 = vpack.c.bf16 %v769_v8, %v769_v8 }
 0x472   : > { %v1926_v10 = vpop.f32.mrf.mxu1 }
 0x473   : > { %779 = vrot.lane.b32.xlu1 %v1840_v9, %s2427_s21  ;;  %s2284_s21 = scalar_lea.vmem %s1633_s5, 128 }
 0x474   : > { %v772_v11 = vpop.f32.mrf.mxu1  ;;  %p2285_p10 = scmp.ne.s32.totalorder %s1633_s5, %s2284_s21 }
 0x476   : > { %v1927_v12 = vpop.f32.mrf.mxu1  ;;  %p2286_p2 = pnand %p2285_p10, %p2581_p0 }
 0x478   : > { %v893_v13 = vpop.f32.mrf.mxu1  ;;  %p2287_p11 = pneg %p2286_p2 }
 0x479   : > { %v1841_v14 = vpack.c.bf16 %v893_v13, %v893_v13 }
 0x47a   : > { %v1938_v15 = vpop.f32.mrf.mxu1 }
 0x47b   : > { %903 = vrot.lane.b32.xlu1 %v1841_v14, %s2428_s14  ;;  %s2434_s14 = smov [#allocation13]  }
 0x47c   : > { %v896_v16 = vpop.f32.mrf.mxu1 }
 0x47e   : > { %v1939_v17 = vpop.f32.mrf.mxu1 }
 0x4a5   : > { %v1017_v27 = vpop.f32.mrf.mxu1 }
 0x4a6   : > { %v1842_v28 = vpack.c.bf16 %v1017_v27, %v1017_v27 }
 0x4a7   : > { %v1950_v29 = vpop.f32.mrf.mxu1 }
 0x4a8   : > { %1027 = vrot.lane.b32.xlu0 %v1842_v28, %s2429_s18  ;;  %s2288_s18 = sshll.u32 %s2434_s14, 4  ;;  %s2289_s18 = int_to_ptr.vmem [resolvable:$false] %s2288_s18 }
 0x4a9   : > { %v1020_v18 = vpop.f32.mrf.mxu1  ;;  %p2291_p7 = scmp.lt.s32.totalorder %s1633_s5, %s2289_s18 }
 0x4ab   : > { %v1951_v19 = vpop.f32.mrf.mxu1 }
 0x4bb   : > { %v1141_v22 = vpop.f32.mrf.mxu1 }
 0x4bc   : > { %v1843_v24 = vpack.c.bf16 %v1141_v22, %v1141_v22 }
 0x4bd   : > { %v1962_v30 = vpop.f32.mrf.mxu1 }
 0x4be   : > { %1151 = vrot.lane.b32.xlu1 %v1843_v24, %s2430_s25  ;;  %s2290_s25 = scalar_lea.vmem %s2289_s18, 256 }
 0x4bf   : > { %v1144_v26 = vpop.f32.mrf.mxu1  ;;  %p2292_p6 = scmp.lt.s32.totalorder %s2290_s25, %s2284_s21 }
 0x4c1   : > { %v1963_v31 = vpop.f32.mrf.mxu1  ;;  %p2293_p9 = por %p2292_p6, %p2291_p7 }
 0x4c3   : > { %v1265_v32 = vpop.f32.mrf.mxu1  ;;  %p2294_p13 = pnand %p2293_p9, %p2287_p11 }
 0x4c4   : > { %v1844_v33 = vpack.c.bf16 %v1265_v32, %v1265_v32 }
 0x4c5   : > { %v1974_v34 = vpop.f32.mrf.mxu1 }
 0x4c6   : > { %1275 = vrot.lane.b32.xlu0 %v1844_v33, %s2431_s22 }
 0x4c7   : > { %v1268_v35 = vpop.f32.mrf.mxu1 }
 0x4c9   : > { %v1975_v36 = vpop.f32.mrf.mxu1 }
 0x4cb   : > { %v1389_v38 = vpop.f32.mrf.mxu1 }
 0x4cc   : > { %v1845_v40 = vpack.c.bf16 %v1389_v38, %v1389_v38 }
 0x4cd   : > { %v1986_v41 = vpop.f32.mrf.mxu1 }
 0x4ce   : > { %1399 = vrot.lane.b32.xlu1 %v1845_v40, %s2432_s26 }
 0x4cf   : > { %v1392_v23 = vpop.f32.mrf.mxu1 }
 0x4d1   : > { %v1987_v42 = vpop.f32.mrf.mxu1 }
 0x4d3   : > { %v1513_v43 = vpop.f32.mrf.mxu1 }
 0x4d4   : > { %v1846_v20 = vpack.c.bf16 %v1513_v43, %v1513_v43 }
 0x4d5   : > { %v1998_v44 = vpop.f32.mrf.mxu1 }
 0x4d6   : > { %1523 = vrot.lane.b32.xlu0 %v1846_v20, %s2433_s24 }
 0x4d7   : > { %v1516_v45 = vpop.f32.mrf.mxu1 }
 0x4d9   : > { %v1999_v46 = vpop.f32.mrf.mxu1 }
 0x4e5   : > { %v780_v47 = vpop.permute.xlu1 %779 }
 0x4e6   : > { %783 = vst.msk [vmem:[#allocation3] sm:$0xf] %vm782_vm7, %v780_v47 }
 0x4ed   : > { %v904_v48 = vpop.permute.xlu1 %903 }
 0x4ee   : > { %907 = vst.msk [vmem:[#allocation3] sm:$0xf] %vm906_vm8, %v904_v48 }
 0x51a   : > { %v1028_v0 = vpop.permute.xlu0 %1027 }
 0x51b   : > { %1031 = vst.msk [vmem:[#allocation3] sm:$0xf] %vm1030_vm9, %v1028_v0 }
 0x530   : > { %v1152_v49 = vpop.permute.xlu1 %1151 }
 0x531   : > { %1155 = vst.msk [vmem:[#allocation3] sm:$0xf] %vm1154_vm10, %v1152_v49 }
 0x538   : > { %v1276_v50 = vpop.permute.xlu0 %1275 }
 0x539   : > { %1279 = vst.msk [vmem:[#allocation3] sm:$0xf] %vm1278_vm11, %v1276_v50 }
 0x540   : > { %v1400_v51 = vpop.permute.xlu1 %1399 }
 0x541   : > { %1403 = vst.msk [vmem:[#allocation3] sm:$0xf] %vm1402_vm12, %v1400_v51 }
 0x548   : > { %v1524_v52 = vpop.permute.xlu0 %1523 }
 0x549   : > { %1527 = vst.msk [vmem:[#allocation3] sm:$0xf] %vm1526_vm13, %v1524_v52 }
 0x550   : > { %v1528_v53 = vld [vmem:[#allocation3] sm:$0xf] }
 0x551   : > { %2005 = vmatmul.mubr.msk.bf16.vlgmr.msra.gmra.mxu0 %vm421_vm1, %v1528_v53 }
 0x552   : > { %2297 = shalt.err (!%p2294_p13)
}
 0x553   : > { %s2298_s22 = scalar_lea.hbm %s1630_s3, 128  ;;  %s2302_s24 = scalar_lea.hbm %s2919_s8, 256 }
 0x554   : > { %p2299_p1 = scmp.ne.s32.totalorder %s1630_s3, %s2298_s22  ;;  %p2303_p12 = scmp.lt.s32.totalorder %s1630_s3, %s2919_s8 }
 0x555   : > { %p2304_p5 = scmp.lt.s32.totalorder %s2302_s24, %s2298_s22 }
 0x556   : > { %p2300_p4 = pnand %p2299_p1, %p2581_p0 }
 0x557   : > { %p2305_p3 = por %p2304_p5, %p2303_p12 }
 0x558   : > { %p2301_p8 = pneg %p2300_p4 }
 0x55a   : > { %p2306_p10 = pnand %p2305_p3, %p2301_p8 }
 0x55c   : > { %2309 = shalt.err (!%p2306_p10)
}
 0x55d   : > { %2023 = dma.vmem_to_hbm [thread:$0]  (%p2581_p0), %s1633_s5, 128, %s1630_s3, %s1604_s13   ;;  %v1830_v54 = vld [vmem:[%s2917_s6] ss:$0 sm:$0xff] }
 0x55e   : > { %s384_s18 = scalar_lea.vmem [#allocation12], %s1789_s15  ;;  %s2862_s26 = scalar_lea.hbm %s2918_s7, %s1836_s19 }
 0x55f   : > { %s1618_s25 = sshll.u32 %s384_s18, 4  ;;  %s1599_s3 = scalar_lea.sflag [#allocation6], %s2611_s23  ;;  %s2864_s25 = int_to_ptr.vmem [resolvable:$true] %s1618_s25 }
 0x560   : > { %s2310_s15 = scalar_lea.vmem %s2864_s25, 128  ;;  %s2435_s30 = smov [#allocation12]  }
 0x561   : > { %p2311_p2 = scmp.ne.s32.totalorder %s2864_s25, %s2310_s15  ;;  %s2314_s5 = sshll.u32 %s2435_s30, 4  ;;  %s2315_s5 = int_to_ptr.vmem [resolvable:$false] %s2314_s5 }
 0x562   : > { %s2316_s19 = scalar_lea.vmem %s2315_s5, 256  ;;  %p2317_p6 = scmp.lt.s32.totalorder %s2864_s25, %s2315_s5 }
 0x563   : > { %p2312_p11 = pnand %p2311_p2, %p2581_p0  ;;  %p2318_p9 = scmp.lt.s32.totalorder %s2316_s19, %s2310_s15 }
 0x565   : > { %p2313_p7 = pneg %p2312_p11  ;;  %p2319_p13 = por %p2318_p9, %p2317_p6 }
 0x567   : > { %p2320_p1 = pnand %p2319_p13, %p2313_p7 }
 0x611   : > { %v1589_v55 = vpop.f32.mrf.mxu0 }
 0x612   : > { %v1590_v56 = vadd.f32 %v1830_v54, %v1589_v55 }
 0x613   : > { %v2006_v57 = vpop.f32.mrf.mxu0 }
 0x614   : > { %1595 = vst.msk [vmem:[%s384_s18] sm:$0xff] %vm421_vm1, %v1590_v56 }
 0x615   : > { %v1592_v58 = vpop.f32.mrf.mxu0 }
 0x616   : > { %2323 = shalt.err (!%p2320_p1)
}
 0x617   : > { %s2324_s13 = scalar_lea.hbm %s2862_s26, 128  ;;  %s2328_s12 = scalar_lea.hbm %s2918_s7, 256 }
 0x618   : > { %p2325_p4 = scmp.ne.s32.totalorder %s2862_s26, %s2324_s13  ;;  %p2329_p5 = scmp.lt.s32.totalorder %s2862_s26, %s2918_s7 }
 0x619   : > { %p2330_p3 = scmp.lt.s32.totalorder %s2328_s12, %s2324_s13 }
 0x61a   : > { %p2326_p8 = pnand %p2325_p4, %p2581_p0 }
 0x61b   : > { %p2331_p10 = por %p2330_p3, %p2329_p5 }
 0x61c   : > { %p2327_p12 = pneg %p2326_p8 }
 0x61e   : > { %p2332_p2 = pnand %p2331_p10, %p2327_p12 }
 0x620   : > { %2335 = shalt.err (!%p2332_p2)
}
 0x621   : > { %2022 = dma.vmem_to_hbm [thread:$0]  (%p2581_p0), %s2864_s25, 128, %s2862_s26, %s1599_s3   ;;  %v2007_v59 = vpop.f32.mrf.mxu0 }
 0x622 PF: > { %s1644_s14 = sand.u32 1, %s2382_s27   ;;  %p2943_p11 = scmp.ne.s32.totalorder %s2931_s16, 0 }
 0x623   : > { %p2944_p7 = scmp.ge.s32.totalorder %s2402_s10, 2  ;;  %s1645_s18 = scalar_lea.sflag [#allocation6], %s1644_s14 }
 0x625   : > { %p2041_p6 = pnand %p2944_p7, %p2943_p11 }
 0x627   : > { %p2042_p9 = pneg %p2041_p6 }
 0x629   : > { %2373 = dma.done.wait (%p2042_p9), %s1645_s18, 128  }
 0x62a   : > { %2375 = vsyncadd (%p2042_p9), %s1645_s18, 4294967168  ;;  %s1654_s22 = scalar_lea.sflag [#allocation14], %s1644_s14 }
 0x62b   : > { %2377 = dma.done.wait (%p2042_p9), %s1654_s22, 128  }
 0x62c   : > { %2379 = vsyncadd (%p2042_p9), %s1654_s22, 4294967168  ;;  %s30_s10 = sadd.s32 1, %s2402_s10   ;;  %s2945_s20 = sld [smem:[#allocation20_spill]] }
 0x62d   : > { %p27_p13 = scmp.ge.s32.totalorder %s30_s10, 4   ;;  %s2946_s27 = smov %s2386_s28 }
 0x62e   : > { %s2947_s28 = smov %s2390_s29  ;;  %s2948_s29 = smov %s2593_s11 }
 0x62f   : > { %s2949_s30 = smov %s2398_s9  ;;  %29 = sbr.rel (!%p27_p13) target bundleno = 14 (0xe), region = 127 }
 0x632   : > { %s2950_s9 = smov %s2945_s20 }
 0x634   :  { %1659 = vsyncpa [#allocation5], 1 }
 0x635   :  { %1661 = vsyncpa [#allocation5 + $0x1], 1 }
 0x636   :  { %1662 = vsyncpa [#allocation8], 1 }
 0x637   :  { %1663 = vsyncpa [#allocation11], 1 }
 0x638   :  { %1664 = vsyncpa [#allocation6], 1 }
 0x639   :  { %1666 = vsyncpa [#allocation6 + $0x1], 1 }
 0x63a   :  { %1667 = vsyncpa [#allocation14], 1 }
 0x63b   :  { %1669 = vsyncpa [#allocation14 + $0x1], 1 }

</bundles_post_ra>
